<compile_context>
chip_gen: v5e
topology: v5e:2x2
jax: 0.10.0
libtpu: 0.0.40
codegen_flags: <defaults>
</compile_context>

<pallas_src>
import functools

import numpy as np
import jax
import jax.numpy as jnp
from jax.experimental import pallas as pl
from jax.experimental.pallas import tpu as pltpu


# --------------------------------------------------------------------------- #
# Pallas kernel
# --------------------------------------------------------------------------- #
def _downsampler_kernel(x_ref, w_ref, csh_ref, psc_ref, psh_ref,
                        o_ref, xs_ref, *, Nb, Ho, Wo, Cin, Cconv):
    """Fused stride-2 conv + maxpool + folded BN + ReLU on a space-to-depth tile.

    x_ref : (Nb, Ho, Wo, 4*Cin)      bf16  space-to-depth input tile
    w_ref : (4, 4*Cin, Cconv)        bf16  conv weights (BN scale pre-folded)
    csh_ref/psc_ref/psh_ref          f32   folded BN shift / pool scale / shift
    o_ref : (Nb, Ho, Wo, Cconv+Cin)  f32
    xs_ref: (Nb, Ho+1, Wo+1, 4*Cin)  bf16  VMEM scratch (zero pad at top/left)
    """
    Cin4 = 4 * Cin
    M = Nb * Ho * Wo

    x = x_ref[...]                                             # (Nb,Ho,Wo,Cin4)

    # -- build the (top/left) zero-padded copy in VMEM -----------------------
    # Only the 1-px border needs zeroing; the interior is overwritten below.
    xs_ref[:, :1, :, :] = jnp.zeros((Nb, 1, Wo + 1, Cin4), xs_ref.dtype)
    xs_ref[:, 1:, :1, :] = jnp.zeros((Nb, Ho, 1, Cin4), xs_ref.dtype)
    xs_ref[:, 1:, 1:, :] = x

    # -- stride-2 3x3 conv == 4 dense bf16 matmuls over s2d blocks -----------
    acc = jnp.zeros((M, Cconv), jnp.float32)
    for p, (db, dwb) in enumerate(((0, 0), (0, 1), (1, 0), (1, 1))):
        patch = xs_ref[:, db:db + Ho, dwb:dwb + Wo, :].reshape(M, Cin4)
        acc = acc + jnp.dot(patch, w_ref[p],
                            preferred_element_type=jnp.float32)
    yc = jnp.maximum(acc + csh_ref[...], 0.0)                  # (M, Cconv)

    # -- 2x2 / stride-2 max pool == max over the 4 s2d channel groups --------
    pool = jnp.maximum(
        jnp.maximum(x[..., 0 * Cin:1 * Cin], x[..., 1 * Cin:2 * Cin]),
        jnp.maximum(x[..., 2 * Cin:3 * Cin], x[..., 3 * Cin:4 * Cin]))
    yp = jnp.maximum(
        pool.reshape(M, Cin).astype(jnp.float32) * psc_ref[...] + psh_ref[...],
        0.0)                                                   # (M, Cin)

    # -- single concat store --------------------------------------------------
    y = jnp.concatenate([yc, yp], axis=-1)                     # (M, Cout)
    o_ref[...] = y.reshape(Nb, Ho, Wo, Cconv + Cin)


# --------------------------------------------------------------------------- #
# Wrapper helpers
# --------------------------------------------------------------------------- #
def _space_to_depth(x_nhwc):
    """(N, H, W, C) -> (N, H/2, W/2, 4C); channel groups ordered (sr, sc, C)."""
    N, H, W, C = x_nhwc.shape
    x = x_nhwc.reshape(N, H // 2, 2, W // 2, 2, C)
    x = x.transpose(0, 1, 3, 2, 4, 5)
    return x.reshape(N, H // 2, W // 2, 4 * C)


def _pack_conv_weight(w_hwio):
    """(3,3,Cin,Cconv) HWIO weights -> (4, 4*Cin, Cconv) per-s2d-patch bf16 weights."""
    cin, cconv = w_hwio.shape[2], w_hwio.shape[3]
    w4 = np.zeros((4, 4 * cin, cconv), np.float32)
    split = lambda k: (0, 1) if k == 0 else (1, k - 1)   # tap -> (block off, sub pos)
    w_np = np.asarray(w_hwio, np.float32)
    for ky in range(3):
        db, sr = split(ky)
        for kx in range(3):
            dwb, sc = split(kx)
            p = db * 2 + dwb
            g = sr * 2 + sc
            w4[p, g * cin:(g + 1) * cin, :] = w_np[ky, kx]
    return jnp.asarray(w4, jnp.bfloat16)


def _round_up(v, m):
    return (v + m - 1) // m * m


def _pick_block_n(N, Ho, Wo, Cin4, Cout, budget_bytes=8 << 20):
    """Largest batch block that (a) divides N, (b) fits a conservative VMEM budget.

    Accounts for lane (128) and sublane padding of the small channel dims.
    """
    in_lane = _round_up(Cin4, 128)
    out_lane = _round_up(Cout, 128)
    best = 1
    for nb in range(1, N + 1):
        if N % nb:
            continue
        in_b = 2 * nb * Ho * _round_up(Wo, 16) * in_lane * 2          # bf16, dbl-buf
        out_b = 2 * nb * Ho * _round_up(Wo, 8) * out_lane * 4         # f32,  dbl-buf
        scr_b = nb * (Ho + 1) * _round_up(Wo + 1, 16) * in_lane * 2   # bf16 scratch
        if in_b + out_b + scr_b <= budget_bytes:
            best = nb
    return best


def downsampler_block(x_nchw, fp):
    """NCHW in / NCHW out DownsamplerBlock forward using the Pallas kernel."""
    N, Cin, H, W = x_nchw.shape
    assert H % 2 == 0 and W % 2 == 0, "DownsamplerBlock kernel assumes even H, W"
    assert Cin == fp["cin"]
    Cconv = fp["cconv"]
    Cout = Cconv + Cin
    Ho, Wo, Cin4 = H // 2, W // 2, 4 * Cin

    x = jnp.transpose(x_nchw, (0, 2, 3, 1))                    # NCHW -> NHWC
    xs2d = _space_to_depth(x).astype(jnp.bfloat16)             # (N, Ho, Wo, 4*Cin)

    Nb = _pick_block_n(N, Ho, Wo, Cin4, Cout)
    kernel = functools.partial(_downsampler_kernel,
                               Nb=Nb, Ho=Ho, Wo=Wo, Cin=Cin, Cconv=Cconv)

    out = pl.pallas_call(
        kernel,
        out_shape=jax.ShapeDtypeStruct((N, Ho, Wo, Cout), jnp.float32),
        grid=(N // Nb,),
        in_specs=[
            pl.BlockSpec((Nb, Ho, Wo, Cin4), lambda n: (n, 0, 0, 0)),
            pl.BlockSpec((4, Cin4, Cconv), lambda n: (0, 0, 0)),
            pl.BlockSpec((1, Cconv), lambda n: (0, 0)),
            pl.BlockSpec((1, Cin), lambda n: (0, 0)),
            pl.BlockSpec((1, Cin), lambda n: (0, 0)),
        ],
        out_specs=pl.BlockSpec((Nb, Ho, Wo, Cout), lambda n: (n, 0, 0, 0)),
        scratch_shapes=[pltpu.VMEM((Nb, Ho + 1, Wo + 1, Cin4), jnp.bfloat16)],
        compiler_params=pltpu.CompilerParams(
            dimension_semantics=("parallel",)),
    )(xs2d, fp["w4"], fp["csh"], fp["psc"], fp["psh"])

    return jnp.transpose(out, (0, 3, 1, 2))                    # NHWC -> NCHW


# --------------------------------------------------------------------------- #
# Deterministic synthetic parameters + BN folding
# --------------------------------------------------------------------------- #
def init_downsampler(key, cin, cout, eps=1e-3):
    cconv = cout - cin
    kw, kb, k1, k2, k3, k4 = jax.random.split(key, 6)
    w = jax.random.normal(kw, (3, 3, cin, cconv), jnp.float32) / np.sqrt(cin * 9.0)
    b = 0.01 * jax.random.normal(kb, (cconv,), jnp.float32)
    gamma = 1.0 + 0.1 * jax.random.normal(k1, (cout,), jnp.float32)
    beta = 0.1 * jax.random.normal(k2, (cout,), jnp.float32)
    mean = 0.1 * jax.random.normal(k3, (cout,), jnp.float32)
    var = 1.0 + 0.1 * jax.random.uniform(k4, (cout,), jnp.float32)
    return dict(w=w, b=b, gamma=gamma, beta=beta, mean=mean, var=var, eps=eps)


def fold_params(p):
    w, b = p["w"], p["b"]
    cin, cconv = w.shape[2], w.shape[3]
    s = p["gamma"] / jnp.sqrt(p["var"] + p["eps"])
    t = p["beta"] - p["mean"] * s
    csc, csh = s[:cconv], t[:cconv] + b * s[:cconv]     # conv bias folded into shift
    psc, psh = s[cconv:], t[cconv:]
    # Fold the conv-branch BN scale directly into the packed weights (f32 math,
    # single bf16 rounding) so the kernel epilogue is add+relu only.
    w_scaled = w * csc.reshape(1, 1, 1, cconv)
    return dict(w4=_pack_conv_weight(np.asarray(w_scaled, np.float32)),
                csh=csh.reshape(1, -1).astype(jnp.float32),
                psc=psc.reshape(1, -1).astype(jnp.float32),
                psh=psh.reshape(1, -1).astype(jnp.float32),
                cin=cin, cconv=cconv)


# --------------------------------------------------------------------------- #
# Pure-JAX reference (matches PyTorch inference semantics)
# --------------------------------------------------------------------------- #
def downsampler_ref(x_nchw, p):
    w_oihw = jnp.transpose(p["w"], (3, 2, 0, 1))
    conv = jax.lax.conv_general_dilated(
        x_nchw, w_oihw, window_strides=(2, 2), padding=((1, 1), (1, 1)),
        dimension_numbers=("NCHW", "OIHW", "NCHW"),
        precision=jax.lax.Precision.HIGHEST)
    conv = conv + p["b"].reshape(1, -1, 1, 1)
    pool = jax.lax.reduce_window(x_nchw, -jnp.inf, jax.lax.max,
                                 (1, 1, 2, 2), (1, 1, 2, 2), "VALID")
    y = jnp.concatenate([conv, pool], axis=1)
    inv = 1.0 / jnp.sqrt(p["var"] + p["eps"])
    y = (y - p["mean"].reshape(1, -1, 1, 1)) * (p["gamma"] * inv).reshape(1, -1, 1, 1)
    y = y + p["beta"].reshape(1, -1, 1, 1)
    return jnp.maximum(y, 0.0)


# --------------------------------------------------------------------------- #
if __name__ == "__main__":
    key = jax.random.PRNGKey(0)
    k_in, k_par = jax.random.split(key)

    N, Cin, H, W = 2, 4, 16, 16
    Cout = 16

    x = jax.random.normal(k_in, (N, Cin, H, W), jnp.float32)
    raw = init_downsampler(k_par, Cin, Cout)
    fp = fold_params(raw)

    out = jax.block_until_ready(downsampler_block(x, fp))
    ref = jax.block_until_ready(downsampler_ref(x, raw))

    assert out.shape == (N, Cout, H // 2, W // 2), out.shape
    assert bool(jnp.all(jnp.isfinite(out)))
    # bf16 activations/weights on the MXU path (f32 accumulation) -> loosened
    # tolerance vs the f32 HIGHEST-precision reference.
    np.testing.assert_allclose(np.asarray(out), np.asarray(ref),
                               rtol=2e-2, atol=2e-2)

    print("KERNEL_OK")
</pallas_src>

<mosaic_0001>
module attributes {stable_mosaic.version = 11 : i64} {
  func.func @_downsampler_kernel(%arg0: i32, %arg1: memref<2x8x8x16xbf16, #tpu.memory_space<vmem>>, %arg2: memref<4x16x12xbf16, #tpu.memory_space<vmem>>, %arg3: memref<1x12xf32, #tpu.memory_space<vmem>>, %arg4: memref<1x4xf32, #tpu.memory_space<vmem>>, %arg5: memref<1x4xf32, #tpu.memory_space<vmem>>, %arg6: memref<2x8x8x16xf32, #tpu.memory_space<vmem>>, %arg7: memref<2x9x9x16xbf16, #tpu.memory_space<vmem>>) attributes {dimension_semantics = [#tpu.dimension_semantics<parallel>], iteration_bounds = array<i64: 1>, scalar_prefetch = 0 : i64, scratch_operands = 1 : i64, tpu.core_type = #tpu.core_type<tc>, window_params = [{transform_indices = @transform_0, window_bounds = array<i64: 2, 8, 8, 16>}, {pipeline_mode = #tpu.pipeline_mode<synchronous>, transform_indices = @transform_1, window_bounds = array<i64: 4, 16, 12>}, {pipeline_mode = #tpu.pipeline_mode<synchronous>, transform_indices = @transform_2, window_bounds = array<i64: 1, 12>}, {pipeline_mode = #tpu.pipeline_mode<synchronous>, transform_indices = @transform_3, window_bounds = array<i64: 1, 4>}, {pipeline_mode = #tpu.pipeline_mode<synchronous>, transform_indices = @transform_4, window_bounds = array<i64: 1, 4>}, {transform_indices = @transform_5, window_bounds = array<i64: 2, 8, 8, 16>}]} {
    %c0 = arith.constant 0 : index
    %c0_0 = arith.constant 0 : index
    %c0_1 = arith.constant 0 : index
    %c0_2 = arith.constant 0 : index
    %0 = vector.load %arg1[%c0, %c0_0, %c0_1, %c0_2] : memref<2x8x8x16xbf16, #tpu.memory_space<vmem>>, vector<2x8x8x16xbf16>
    %cst = arith.constant 0.000000e+00 : bf16
    %1 = vector.broadcast %cst : bf16 to vector<2x1x9x16xbf16>
    %c0_3 = arith.constant 0 : index
    %c0_4 = arith.constant 0 : index
    %c0_5 = arith.constant 0 : index
    %c0_6 = arith.constant 0 : index
    %2 = vector.load %arg7[%c0_3, %c0_4, %c0_5, %c0_6] : memref<2x9x9x16xbf16, #tpu.memory_space<vmem>>, vector<2x1x9x16xbf16>
    tpu.vector_store %arg7[%c0_3, %c0_4, %c0_5, %c0_6], %1 {strides = array<i32>} : memref<2x9x9x16xbf16, #tpu.memory_space<vmem>>, vector<2x1x9x16xbf16>,
    %cst_7 = arith.constant 0.000000e+00 : bf16
    %3 = vector.broadcast %cst_7 : bf16 to vector<2x8x1x16xbf16>
    %c0_8 = arith.constant 0 : index
    %c1 = arith.constant 1 : index
    %c0_9 = arith.constant 0 : index
    %c0_10 = arith.constant 0 : index
    %4 = vector.load %arg7[%c0_8, %c1, %c0_9, %c0_10] : memref<2x9x9x16xbf16, #tpu.memory_space<vmem>>, vector<2x8x1x16xbf16>
    tpu.vector_store %arg7[%c0_8, %c1, %c0_9, %c0_10], %3 {strides = array<i32>} : memref<2x9x9x16xbf16, #tpu.memory_space<vmem>>, vector<2x8x1x16xbf16>,
    %c0_11 = arith.constant 0 : index
    %c1_12 = arith.constant 1 : index
    %c1_13 = arith.constant 1 : index
    %c0_14 = arith.constant 0 : index
    %5 = vector.load %arg7[%c0_11, %c1_12, %c1_13, %c0_14] : memref<2x9x9x16xbf16, #tpu.memory_space<vmem>>, vector<2x8x8x16xbf16>
    tpu.vector_store %arg7[%c0_11, %c1_12, %c1_13, %c0_14], %0 {strides = array<i32>} : memref<2x9x9x16xbf16, #tpu.memory_space<vmem>>, vector<2x8x8x16xbf16>,
    %cst_15 = arith.constant 0.000000e+00 : f32
    %6 = vector.broadcast %cst_15 : f32 to vector<128x12xf32>
    %c0_16 = arith.constant 0 : index
    %c0_17 = arith.constant 0 : index
    %c0_18 = arith.constant 0 : index
    %c0_19 = arith.constant 0 : index
    %7 = vector.load %arg7[%c0_16, %c0_17, %c0_18, %c0_19] : memref<2x9x9x16xbf16, #tpu.memory_space<vmem>>, vector<2x8x8x16xbf16>
    %8 = vector.shape_cast %7 : vector<2x8x8x16xbf16> to vector<128x16xbf16>
    %c0_20 = arith.constant 0 : index
    %c0_21 = arith.constant 0 : index
    %c0_22 = arith.constant 0 : index
    %9 = vector.load %arg2[%c0_20, %c0_21, %c0_22] : memref<4x16x12xbf16, #tpu.memory_space<vmem>>, vector<1x16x12xbf16>
    %10 = vector.shape_cast %9 : vector<1x16x12xbf16> to vector<16x12xbf16>
    %cst_23 = arith.constant dense<0.000000e+00> : vector<128x12xf32>
    %11 = tpu.matmul %8, %10, %cst_23 {dimension_numbers = #tpu.dot_dimension_numbers<[1], [0], [0], [1], [0, 0, 1, 1], [], []>} : vector<128x16xbf16>, vector<16x12xbf16>, vector<128x12xf32> -> vector<128x12xf32>
    %12 = arith.addf %6, %11 : vector<128x12xf32>
    %c0_24 = arith.constant 0 : index
    %c0_25 = arith.constant 0 : index
    %c1_26 = arith.constant 1 : index
    %c0_27 = arith.constant 0 : index
    %13 = vector.load %arg7[%c0_24, %c0_25, %c1_26, %c0_27] : memref<2x9x9x16xbf16, #tpu.memory_space<vmem>>, vector<2x8x8x16xbf16>
    %14 = vector.shape_cast %13 : vector<2x8x8x16xbf16> to vector<128x16xbf16>
    %c1_28 = arith.constant 1 : index
    %c0_29 = arith.constant 0 : index
    %c0_30 = arith.constant 0 : index
    %15 = vector.load %arg2[%c1_28, %c0_29, %c0_30] : memref<4x16x12xbf16, #tpu.memory_space<vmem>>, vector<1x16x12xbf16>
    %16 = vector.shape_cast %15 : vector<1x16x12xbf16> to vector<16x12xbf16>
    %cst_31 = arith.constant dense<0.000000e+00> : vector<128x12xf32>
    %17 = tpu.matmul %14, %16, %cst_31 {dimension_numbers = #tpu.dot_dimension_numbers<[1], [0], [0], [1], [0, 0, 1, 1], [], []>} : vector<128x16xbf16>, vector<16x12xbf16>, vector<128x12xf32> -> vector<128x12xf32>
    %18 = arith.addf %12, %17 : vector<128x12xf32>
    %c0_32 = arith.constant 0 : index
    %c1_33 = arith.constant 1 : index
    %c0_34 = arith.constant 0 : index
    %c0_35 = arith.constant 0 : index
    %19 = vector.load %arg7[%c0_32, %c1_33, %c0_34, %c0_35] : memref<2x9x9x16xbf16, #tpu.memory_space<vmem>>, vector<2x8x8x16xbf16>
    %20 = vector.shape_cast %19 : vector<2x8x8x16xbf16> to vector<128x16xbf16>
    %c2 = arith.constant 2 : index
    %c0_36 = arith.constant 0 : index
    %c0_37 = arith.constant 0 : index
    %21 = vector.load %arg2[%c2, %c0_36, %c0_37] : memref<4x16x12xbf16, #tpu.memory_space<vmem>>, vector<1x16x12xbf16>
    %22 = vector.shape_cast %21 : vector<1x16x12xbf16> to vector<16x12xbf16>
    %cst_38 = arith.constant dense<0.000000e+00> : vector<128x12xf32>
    %23 = tpu.matmul %20, %22, %cst_38 {dimension_numbers = #tpu.dot_dimension_numbers<[1], [0], [0], [1], [0, 0, 1, 1], [], []>} : vector<128x16xbf16>, vector<16x12xbf16>, vector<128x12xf32> -> vector<128x12xf32>
    %24 = arith.addf %18, %23 : vector<128x12xf32>
    %c0_39 = arith.constant 0 : index
    %c1_40 = arith.constant 1 : index
    %c1_41 = arith.constant 1 : index
    %c0_42 = arith.constant 0 : index
    %25 = vector.load %arg7[%c0_39, %c1_40, %c1_41, %c0_42] : memref<2x9x9x16xbf16, #tpu.memory_space<vmem>>, vector<2x8x8x16xbf16>
    %26 = vector.shape_cast %25 : vector<2x8x8x16xbf16> to vector<128x16xbf16>
    %c3 = arith.constant 3 : index
    %c0_43 = arith.constant 0 : index
    %c0_44 = arith.constant 0 : index
    %27 = vector.load %arg2[%c3, %c0_43, %c0_44] : memref<4x16x12xbf16, #tpu.memory_space<vmem>>, vector<1x16x12xbf16>
    %28 = vector.shape_cast %27 : vector<1x16x12xbf16> to vector<16x12xbf16>
    %cst_45 = arith.constant dense<0.000000e+00> : vector<128x12xf32>
    %29 = tpu.matmul %26, %28, %cst_45 {dimension_numbers = #tpu.dot_dimension_numbers<[1], [0], [0], [1], [0, 0, 1, 1], [], []>} : vector<128x16xbf16>, vector<16x12xbf16>, vector<128x12xf32> -> vector<128x12xf32>
    %30 = arith.addf %24, %29 : vector<128x12xf32>
    %c0_46 = arith.constant 0 : index
    %c0_47 = arith.constant 0 : index
    %31 = vector.load %arg3[%c0_46, %c0_47] : memref<1x12xf32, #tpu.memory_space<vmem>>, vector<1x12xf32>
    %32 = vector.broadcast %31 : vector<1x12xf32> to vector<128x12xf32>
    %33 = arith.addf %30, %32 : vector<128x12xf32>
    %cst_48 = arith.constant 0.000000e+00 : f32
    %34 = vector.broadcast %cst_48 : f32 to vector<128x12xf32>
    %35 = arith.maximumf %33, %34 : vector<128x12xf32>
    %36 = vector.extract_strided_slice %0 {offsets = [0, 0, 0, 0], sizes = [2, 8, 8, 4], strides = [1, 1, 1, 1]} : vector<2x8x8x16xbf16> to vector<2x8x8x4xbf16>
    %37 = vector.extract_strided_slice %0 {offsets = [0, 0, 0, 4], sizes = [2, 8, 8, 4], strides = [1, 1, 1, 1]} : vector<2x8x8x16xbf16> to vector<2x8x8x4xbf16>
    %38 = arith.maximumf %36, %37 : vector<2x8x8x4xbf16>
    %39 = vector.extract_strided_slice %0 {offsets = [0, 0, 0, 8], sizes = [2, 8, 8, 4], strides = [1, 1, 1, 1]} : vector<2x8x8x16xbf16> to vector<2x8x8x4xbf16>
    %40 = vector.extract_strided_slice %0 {offsets = [0, 0, 0, 12], sizes = [2, 8, 8, 4], strides = [1, 1, 1, 1]} : vector<2x8x8x16xbf16> to vector<2x8x8x4xbf16>
    %41 = arith.maximumf %39, %40 : vector<2x8x8x4xbf16>
    %42 = arith.maximumf %38, %41 : vector<2x8x8x4xbf16>
    %43 = vector.shape_cast %42 : vector<2x8x8x4xbf16> to vector<128x4xbf16>
    %44 = arith.extf %43 : vector<128x4xbf16> to vector<128x4xf32>
    %c0_49 = arith.constant 0 : index
    %c0_50 = arith.constant 0 : index
    %45 = vector.load %arg4[%c0_49, %c0_50] : memref<1x4xf32, #tpu.memory_space<vmem>>, vector<1x4xf32>
    %46 = vector.broadcast %45 : vector<1x4xf32> to vector<128x4xf32>
    %47 = arith.mulf %44, %46 : vector<128x4xf32>
    %c0_51 = arith.constant 0 : index
    %c0_52 = arith.constant 0 : index
    %48 = vector.load %arg5[%c0_51, %c0_52] : memref<1x4xf32, #tpu.memory_space<vmem>>, vector<1x4xf32>
    %49 = vector.broadcast %48 : vector<1x4xf32> to vector<128x4xf32>
    %50 = arith.addf %47, %49 : vector<128x4xf32>
    %cst_53 = arith.constant 0.000000e+00 : f32
    %51 = vector.broadcast %cst_53 : f32 to vector<128x4xf32>
    %52 = arith.maximumf %50, %51 : vector<128x4xf32>
    %53 = tpu.concatenate %35, %52 in 1 : vector<128x12xf32>, vector<128x4xf32> -> vector<128x16xf32>
    %54 = vector.shape_cast %53 : vector<128x16xf32> to vector<2x8x8x16xf32>
    %c0_54 = arith.constant 0 : index
    %c0_55 = arith.constant 0 : index
    %c0_56 = arith.constant 0 : index
    %c0_57 = arith.constant 0 : index
    %55 = vector.load %arg6[%c0_54, %c0_55, %c0_56, %c0_57] : memref<2x8x8x16xf32, #tpu.memory_space<vmem>>, vector<2x8x8x16xf32>
    tpu.vector_store %arg6[%c0_54, %c0_55, %c0_56, %c0_57], %54 {strides = array<i32>} : memref<2x8x8x16xf32, #tpu.memory_space<vmem>>, vector<2x8x8x16xf32>,
    return
  }
  func.func @transform_0(%arg0: i32) -> (i32, i32, i32, i32) {
    %c0_i32 = arith.constant 0 : i32
    %c0_i32_0 = arith.constant 0 : i32
    %c0_i32_1 = arith.constant 0 : i32
    %c0_i32_2 = arith.constant 0 : i32
    return %arg0, %c0_i32, %c0_i32_0, %c0_i32_1 : i32, i32, i32, i32
  }
  func.func @transform_1(%arg0: i32) -> (i32, i32, i32) {
    %c0_i32 = arith.constant 0 : i32
    %c0_i32_0 = arith.constant 0 : i32
    %c0_i32_1 = arith.constant 0 : i32
    %c0_i32_2 = arith.constant 0 : i32
    return %c0_i32, %c0_i32_0, %c0_i32_1 : i32, i32, i32
  }
  func.func @transform_2(%arg0: i32) -> (i32, i32) {
    %c0_i32 = arith.constant 0 : i32
    %c0_i32_0 = arith.constant 0 : i32
    %c0_i32_1 = arith.constant 0 : i32
    return %c0_i32, %c0_i32_0 : i32, i32
  }
  func.func @transform_3(%arg0: i32) -> (i32, i32) {
    %c0_i32 = arith.constant 0 : i32
    %c0_i32_0 = arith.constant 0 : i32
    %c0_i32_1 = arith.constant 0 : i32
    return %c0_i32, %c0_i32_0 : i32, i32
  }
  func.func @transform_4(%arg0: i32) -> (i32, i32) {
    %c0_i32 = arith.constant 0 : i32
    %c0_i32_0 = arith.constant 0 : i32
    %c0_i32_1 = arith.constant 0 : i32
    return %c0_i32, %c0_i32_0 : i32, i32
  }
  func.func @transform_5(%arg0: i32) -> (i32, i32, i32, i32) {
    %c0_i32 = arith.constant 0 : i32
    %c0_i32_0 = arith.constant 0 : i32
    %c0_i32_1 = arith.constant 0 : i32
    %c0_i32_2 = arith.constant 0 : i32
    return %arg0, %c0_i32, %c0_i32_0, %c0_i32_1 : i32, i32, i32, i32
  }
}

</mosaic_0001>

<bundles_post_ra>
// kernel: tpu_custom_call.1
= control target key start
LH: loop header
LB: loop body
LE: loop exit
PB: predicated region body
PF: predicated region fallthrough
CT: control target
= control target key end

     0   :  { %10 = vsyncpa [#allocation4], 0  ;;  %s2790_s0 = inlined_call_operand.hbm [shape: bf16[2,8,8,16], index: 0, kind: input, shape index: {}]   ;;  %s2791_s1 = inlined_call_operand.vmem [shape: bf16[4,16,12], index: 1, kind: input, shape index: {}]   ;;  %s2792_s2 = inlined_call_operand.vmem [shape: f32[1,12], index: 2, kind: input, shape index: {}]   ;;  %s2793_s3 = inlined_call_operand.vmem [shape: f32[1,4], index: 3, kind: input, shape index: {}]   ;;  %s2794_s4 = inlined_call_operand.vmem [shape: f32[1,4], index: 4, kind: input, shape index: {}]   ;;  %s2795_s5 = inlined_call_operand.hbm [shape: f32[2,8,8,16], index: 5, kind: output, shape index: {}]  }
   0x1   :  { %11 = vsyncpa [#allocation5], 0  ;;  %s16_s20 = sshll.u32 %s2790_s0, 4  ;;  %s2124_s21 = smov [#allocation3]   ;;  %s17_s20 = int_to_ptr.hbm [resolvable:$true] %s16_s20 }
   0x2   :  { %s18_s22 = sshll.u32 %s2124_s21, 4  ;;  %s2125_s23 = smov 64   ;;  %s19_s22 = int_to_ptr.vmem [resolvable:$true] %s18_s22 }
   0x3   :  { %s2126_s24 = smov 4  }
   0x4   :  { %24 = dma.hbm_to_vmem [thread:$0]  %s17_s20, 1024, %s19_s22, [#allocation4], %s2125_s23, %s2125_s23, %s2126_s24  }
   0x5   :  { %2120 = dma.done.wait [#allocation4], 1024  }
   0x6   :  { %2121 = vsyncadd [#allocation4], 4294966272  ;;  %vm56_vm0 = vcmask 122880   ;;  %vm57_vm1 = vsmask.f32 256  ;;  %vm54_vm4 = vcmask 125952  }
   0x7   :  { %vm2167_vm2 = vmand %vm56_vm0, %vm57_vm1  ;;  %v2171_v1 = vld [vmem:[#allocation3 + $0x10] sm:$0xf]  ;;  %v2173_v2 = vld [vmem:[#allocation3 + $0x14] sm:$0xf]  ;;  %vm276_vm3 = vsmask.f32 7938 }
   0x8   :  { %v79_v3 = vld [vmem:[#allocation2 + $0x28] sm:$0x1]  ;;  %v82_v5 = vld [vmem:[#allocation2 + $0x30] sm:$0x1]  ;;  %v156_v6 = vshrl.u32 %v2173_v2, 16  ;;  %v1433_v7 = vunpack.c.l.bf16 %v2171_v1  ;;  %v159_v9 = vshll.u32 %v2173_v2, 16  ;;  %v1434_v10 = vunpack.c.l.bf16 %v2173_v2  ;;  %vm2211_vm5 = vmand %vm54_vm4, %vm276_vm3 }
   0x9   :  { %v80_v4 = vsel %vm2167_vm2, 0, %v79_v3  ;;  %v83_v8 = vsel %vm2167_vm2, 0, %v82_v5  ;;  %v148_v11 = vshrl.u32 %v2171_v1, 16  ;;  %v305_v13 = vld [vmem:[#allocation2 + $0x2c] sm:$0x1]  ;;  %v151_v15 = vshll.u32 %v2171_v1, 16 }
   0xa   :  { %81 = vst [vmem:[#allocation2 + $0x28] sm:$0x1] %v80_v4  ;;  %v158_v12 = vrot.slane %v156_v6, 7  ;;  %v311_v14 = vld [vmem:[#allocation2 + $0x34] sm:$0x1]  ;;  %v1999_v16 = vpack.i.bf16 %v1434_v10, %v1433_v7  ;;  %s2127_s0 = smov 124  }
   0xb   :  { %84 = vst [vmem:[#allocation2 + $0x30] sm:$0x1] %v83_v8  ;;  %v150_v17 = vrot.slane %v148_v11, 7  ;;  %v2189_v18 = vld [vmem:[#allocation3] sm:$0xf]  ;;  %vm668_vm9 = vcmask 130048  }
   0xc   :  { %v2191_v19 = vld [vmem:[#allocation3 + $0x4] sm:$0xf]  ;;  %v162_v20 = vrot.slane %v158_v12, 4  ;;  %v67_v21 = vld [vmem:[#allocation2 + $0x8] sm:$0x1]  ;;  %v1429_v24 = vunpack.c.l.bf16 %v2189_v18  ;;  %v161_v25 = vor.u32 %v159_v9, %v158_v12  ;;  %2000 = vrot.lane.b32.xlu1 %v1999_v16, %s2127_s0  ;;  %v116_v35 = vshrl.u32 %v2189_v18, 16 }
   0xd   :  { %v70_v22 = vld [vmem:[#allocation2 + $0x10] sm:$0x1]  ;;  %v124_v23 = vshrl.u32 %v2191_v19, 16  ;;  %v153_v26 = vor.u32 %v151_v15, %v150_v17  ;;  %v154_v27 = vrot.slane %v150_v17, 4  ;;  %v68_v28 = vsel %vm2167_vm2, 0, %v67_v21  ;;  %s1828_s16 = sshll.u32 %s2795_s5, 4  ;;  %s1829_s16 = int_to_ptr.hbm [resolvable:$true] %s1828_s16 }
   0xe   :  { %v312_v29 = vsel %vm2167_vm2, %v162_v20, %v311_v14  ;;  %69 = vst [vmem:[#allocation2 + $0x8] sm:$0x1] %v68_v28  ;;  %v71_v30 = vsel %vm2167_vm2, 0, %v70_v22  ;;  %v287_v32 = vld [vmem:[#allocation2 + $0x14] sm:$0x1]  ;;  %v1430_v33 = vunpack.c.l.bf16 %v2191_v19  ;;  %v119_v36 = vshll.u32 %v2189_v18, 16 }
   0xf   :  { %v126_v31 = vrot.slane %v124_v23, 7  ;;  %313 = vst [vmem:[#allocation2 + $0x34] sm:$0x1] %v312_v29  ;;  %v306_v34 = vsel %vm2167_vm2, %v154_v27, %v305_v13  ;;  %v2207_v37 = vld [vmem:[#allocation3 + $0x18] sm:$0xf]  ;;  %v127_v40 = vshll.u32 %v2191_v19, 16 }
  0x10   :  { %307 = vst [vmem:[#allocation2 + $0x2c] sm:$0x1] %v306_v34  ;;  %v281_v42 = vld [vmem:[#allocation2 + $0xc] sm:$0x1]  ;;  %v1989_v43 = vpack.i.bf16 %v1430_v33, %v1429_v24  ;;  %v118_v46 = vrot.slane %v116_v35, 7  ;;  %v1435_v47 = vunpack.c.l.bf16 %v2207_v37  ;;  %v164_v48 = vshrl.u32 %v2207_v37, 16 }
  0x11   :  { %v302_v39 = vld [vmem:[#allocation2 + $0x28] sm:$0xf]  ;;  %v130_v41 = vrot.slane %v126_v31, 4  ;;  %72 = vst [vmem:[#allocation2 + $0x10] sm:$0x1] %v71_v30  ;;  %v129_v61 = vor.u32 %v127_v40, %v126_v31  ;;  %v167_v9 = vshll.u32 %v2207_v37, 16 }
  0x12   :  { %v308_v44 = vld [vmem:[#allocation2 + $0x30] sm:$0xf]  ;;  %v303_v45 = vsel %vm2211_vm5, %v153_v26, %v302_v39  ;;  %1990 = vrot.lane.b32.xlu0 %v1989_v43, %s2127_s0  ;;  %v2229_v51 = vld [vmem:[#allocation3 + $0x1c] sm:$0xf]  ;;  %v85_v52 = vld [vmem:[#allocation2 + $0x38] sm:$0x1]  ;;  %v121_v53 = vor.u32 %v119_v36, %v118_v46 }
  0x13   :  { %v309_v49 = vsel %vm2211_vm5, %v161_v25, %v308_v44  ;;  %304 = vst [vmem:[#allocation2 + $0x28] sm:$0xf] %v303_v45  ;;  %v288_v50 = vsel %vm2167_vm2, %v130_v41, %v287_v32  ;;  %v122_v54 = vrot.slane %v118_v46, 4  ;;  %v86_v55 = vsel %vm2167_vm2, 0, %v85_v52  ;;  %v88_v56 = vld [vmem:[#allocation2 + $0x40] sm:$0x1] }
  0x14   :  { %310 = vst [vmem:[#allocation2 + $0x30] sm:$0xf] %v309_v49  ;;  %v1436_v57 = vunpack.c.l.bf16 %v2229_v51  ;;  %v89_v58 = vsel %vm2167_vm2, 0, %v88_v56  ;;  %v172_v59 = vshrl.u32 %v2229_v51, 16  ;;  %v166_v60 = vrot.slane %v164_v48, 7  ;;  %v1977_v38 = vld [vmem:[%s2791_s1 + $0x10] sm:$0xff] }
  0x15   :  { %289 = vst [vmem:[#allocation2 + $0x14] sm:$0x1] %v288_v50  ;;  %v278_v62 = vld [vmem:[#allocation2 + $0x8] sm:$0xf]  ;;  %v282_v63 = vsel %vm2167_vm2, %v122_v54, %v281_v42  ;;  %v317_v3 = vld [vmem:[#allocation2 + $0x3c] sm:$0x1]  ;;  %957 = vmatpush.bf16.msra.mxu2 %v1977_v38 }
  0x16   :  { %87 = vst [vmem:[#allocation2 + $0x38] sm:$0x1] %v86_v55  ;;  %v2004_v4 = vpack.i.bf16 %v1436_v57, %v1435_v47  ;;  %v279_v5 = vsel %vm2211_vm5, %v121_v53, %v278_v62  ;;  %v174_v6 = vrot.slane %v172_v59, 7  ;;  %v323_v8 = vld [vmem:[#allocation2 + $0x44] sm:$0x1]  ;;  %v170_v11 = vrot.slane %v166_v60, 4 }
  0x17   :  { %283 = vst [vmem:[#allocation2 + $0xc] sm:$0x1] %v282_v63  ;;  %v2247_v12 = vld [vmem:[#allocation3 + $0x8] sm:$0xf]  ;;  %v175_v14 = vshll.u32 %v2229_v51, 16  ;;  %v169_v17 = vor.u32 %v167_v9, %v166_v60  ;;  %vm1789_vm10 = vcmask 97280  }
  0x18   :  { %280 = vst [vmem:[#allocation2 + $0x8] sm:$0xf] %v279_v5  ;;  %2005 = vrot.lane.b32.xlu1 %v2004_v4, %s2127_s0  ;;  %v284_v13 = vld [vmem:[#allocation2 + $0x10] sm:$0xf]  ;;  %v178_v15 = vrot.slane %v174_v6, 4  ;;  %v318_v20 = vsel %vm2167_vm2, %v170_v11, %v317_v3  ;;  %v1431_v25 = vunpack.c.l.bf16 %v2247_v12  ;;  %v132_v30 = vshrl.u32 %v2247_v12, 16 }
  0x19   :  { %90 = vst [vmem:[#allocation2 + $0x40] sm:$0x1] %v89_v58  ;;  %v285_v16 = vsel %vm2211_vm5, %v129_v61, %v284_v13  ;;  %v2254_v21 = vld [vmem:[#allocation3 + $0xc] sm:$0xf]  ;;  %v73_v22 = vld [vmem:[#allocation2 + $0x18] sm:$0x1]  ;;  %v177_v31 = vor.u32 %v175_v14, %v174_v6 }
  0x1a   :  { %v76_v23 = vld [vmem:[#allocation2 + $0x20] sm:$0x1]  ;;  %286 = vst [vmem:[#allocation2 + $0x10] sm:$0xf] %v285_v16  ;;  %v324_v26 = vsel %vm2167_vm2, %v178_v15, %v323_v8  ;;  %v74_v27 = vsel %vm2167_vm2, 0, %v73_v22  ;;  %v140_v28 = vshrl.u32 %v2254_v21, 16  ;;  %v1432_v29 = vunpack.c.l.bf16 %v2254_v21 }
  0x1b   :  { %325 = vst [vmem:[#allocation2 + $0x44] sm:$0x1] %v324_v26  ;;  %v77_v34 = vsel %vm2167_vm2, 0, %v76_v23  ;;  %v293_v36 = vld [vmem:[#allocation2 + $0x1c] sm:$0x1]  ;;  %v134_v42 = vrot.slane %v132_v30, 7 }
  0x1c   :  { %319 = vst [vmem:[#allocation2 + $0x3c] sm:$0x1] %v318_v20  ;;  %v142_v35 = vrot.slane %v140_v28, 7  ;;  %v299_v40 = vld [vmem:[#allocation2 + $0x24] sm:$0x1]  ;;  %v1994_v41 = vpack.i.bf16 %v1432_v29, %v1431_v25  ;;  %v135_v43 = vshll.u32 %v2247_v12, 16 }
  0x1d   :  { %v314_v32 = vld [vmem:[#allocation2 + $0x38] sm:$0xf]  ;;  %75 = vst [vmem:[#allocation2 + $0x18] sm:$0x1] %v74_v27  ;;  %v143_v44 = vshll.u32 %v2254_v21, 16  ;;  %v138_v49 = vrot.slane %v134_v42, 4 }
  0x1e   :  { %v315_v39 = vsel %vm2211_vm5, %v169_v17, %v314_v32  ;;  %v146_v45 = vrot.slane %v142_v35, 4  ;;  %v2274_v46 = vld [vmem:[#allocation3 + $0x30] sm:$0xf]  ;;  %78 = vst [vmem:[#allocation2 + $0x20] sm:$0x1] %v77_v34  ;;  %1995 = vrot.lane.b32.xlu0 %v1994_v41, %s2127_s0  ;;  %v137_v59 = vor.u32 %v135_v43, %v134_v42  ;;  %s2132_s17 = smov 128  }
  0x1f   :  { %316 = vst [vmem:[#allocation2 + $0x38] sm:$0xf] %v315_v39  ;;  %v212_v50 = vshrl.u32 %v2274_v46, 16  ;;  %v2282_v54 = vld [vmem:[#allocation3 + $0x34] sm:$0xf]  ;;  %v1441_v58 = vunpack.c.l.bf16 %v2274_v46  ;;  %v294_v60 = vsel %vm2167_vm2, %v138_v49, %v293_v36  ;;  %v145_v6 = vor.u32 %v143_v44, %v142_v35  ;;  %s2133_s18 = smov 8  }
  0x20   :  { %v320_v48 = vld [vmem:[#allocation2 + $0x40] sm:$0xf]  ;;  %v300_v53 = vsel %vm2167_vm2, %v146_v45, %v299_v40  ;;  %v103_v55 = vld [vmem:[#allocation2 + $0x70] sm:$0x1]  ;;  %v106_v56 = vld [vmem:[#allocation2 + $0x78] sm:$0x1]  ;;  %v1442_v4 = vunpack.c.l.bf16 %v2282_v54 }
  0x21   :  { %v321_v52 = vsel %vm2211_vm5, %v177_v31, %v320_v48  ;;  %v104_v61 = vsel %vm2167_vm2, 0, %v103_v55  ;;  %v220_v62 = vshrl.u32 %v2282_v54, 16  ;;  %301 = vst [vmem:[#allocation2 + $0x24] sm:$0x1] %v300_v53  ;;  %v107_v63 = vsel %vm2167_vm2, 0, %v106_v56 }
  0x22   :  { %322 = vst [vmem:[#allocation2 + $0x40] sm:$0xf] %v321_v52  ;;  %v353_v3 = vld [vmem:[#allocation2 + $0x74] sm:$0x1]  ;;  %v214_v5 = vrot.slane %v212_v50, 7  ;;  %v2019_v13 = vpack.i.bf16 %v1442_v4, %v1441_v58  ;;  %v215_v14 = vshll.u32 %v2274_v46, 16 }
  0x23   :  { %295 = vst [vmem:[#allocation2 + $0x1c] sm:$0x1] %v294_v60  ;;  %v222_v8 = vrot.slane %v220_v62, 7  ;;  %v359_v9 = vld [vmem:[#allocation2 + $0x7c] sm:$0x1]  ;;  %v223_v17 = vshll.u32 %v2282_v54, 16 }
  0x24   :  { %v290_v11 = vld [vmem:[#allocation2 + $0x18] sm:$0xf]  ;;  %105 = vst [vmem:[#allocation2 + $0x70] sm:$0x1] %v104_v61  ;;  %v218_v15 = vrot.slane %v214_v5, 4  ;;  %v217_v36 = vor.u32 %v215_v14, %v214_v5 }
  0x25   :  { %v291_v16 = vsel %vm2211_vm5, %v137_v59, %v290_v11  ;;  %108 = vst [vmem:[#allocation2 + $0x78] sm:$0x1] %v107_v63  ;;  %v226_v20 = vrot.slane %v222_v8, 4  ;;  %v2301_v22 = vld [vmem:[#allocation3 + $0x20] sm:$0xf]  ;;  %v225_v42 = vor.u32 %v223_v17, %v222_v8 }
  0x26   :  { %v296_v23 = vld [vmem:[#allocation2 + $0x20] sm:$0xf]  ;;  %292 = vst [vmem:[#allocation2 + $0x18] sm:$0xf] %v291_v16  ;;  %v354_v26 = vsel %vm2167_vm2, %v218_v15, %v353_v3  ;;  %v2305_v27 = vld [vmem:[#allocation3 + $0x24] sm:$0xf]  ;;  %v1437_v28 = vunpack.c.l.bf16 %v2301_v22  ;;  %2020 = vrot.lane.b32.xlu0 %v2019_v13, %s2127_s0 }
  0x27   :  { %v297_v30 = vsel %vm2211_vm5, %v145_v6, %v296_v23  ;;  %v360_v31 = vsel %vm2167_vm2, %v226_v20, %v359_v9  ;;  %355 = vst [vmem:[#allocation2 + $0x74] sm:$0x1] %v354_v26  ;;  %v91_v32 = vld [vmem:[#allocation2 + $0x50] sm:$0x1]  ;;  %v94_v34 = vld [vmem:[#allocation2 + $0x58] sm:$0x1]  ;;  %v1438_v35 = vunpack.c.l.bf16 %v2305_v27 }
  0x28   :  { %298 = vst [vmem:[#allocation2 + $0x20] sm:$0xf] %v297_v30  ;;  %v92_v39 = vsel %vm2167_vm2, 0, %v91_v32  ;;  %v95_v40 = vsel %vm2167_vm2, 0, %v94_v34  ;;  %v188_v41 = vshrl.u32 %v2305_v27, 16  ;;  %v191_v48 = vshll.u32 %v2305_v27, 16 }
  0x29   :  { %361 = vst [vmem:[#allocation2 + $0x7c] sm:$0x1] %v360_v31  ;;  %v335_v43 = vld [vmem:[#allocation2 + $0x5c] sm:$0x1]  ;;  %v2009_v44 = vpack.i.bf16 %v1438_v35, %v1437_v28  ;;  %v180_v49 = vshrl.u32 %v2301_v22, 16  ;;  %v183_v50 = vshll.u32 %v2301_v22, 16 }
  0x2a   :  { %93 = vst [vmem:[#allocation2 + $0x50] sm:$0x1] %v92_v39  ;;  %v190_v45 = vrot.slane %v188_v41, 7  ;;  %v329_v53 = vld [vmem:[#allocation2 + $0x54] sm:$0x1] }
  0x2b   :  { %v350_v52 = vld [vmem:[#allocation2 + $0x70] sm:$0xf]  ;;  %96 = vst [vmem:[#allocation2 + $0x58] sm:$0x1] %v95_v40  ;;  %2010 = vrot.lane.b32.xlu2 %v2009_v44, %s2127_s0  ;;  %v2327_v55 = vld [vmem:[#allocation3 + $0x38] sm:$0xf] }
  0x2c   :  { %v356_v56 = vld [vmem:[#allocation2 + $0x78] sm:$0xf]  ;;  %v351_v59 = vsel %vm2211_vm5, %v217_v36, %v350_v52  ;;  %v194_v60 = vrot.slane %v190_v45, 4  ;;  %v182_v61 = vrot.slane %v180_v49, 7  ;;  %v2331_v62 = vld [vmem:[#allocation3 + $0x3c] sm:$0xf]  ;;  %v1443_v6 = vunpack.c.l.bf16 %v2327_v55 }
  0x2d   :  { %v357_v63 = vsel %vm2211_vm5, %v225_v42, %v356_v56  ;;  %352 = vst [vmem:[#allocation2 + $0x70] sm:$0xf] %v351_v59  ;;  %v109_v3 = vld [vmem:[#allocation2 + $0x80] sm:$0x1]  ;;  %v112_v5 = vld [vmem:[#allocation2 + $0x88] sm:$0x1]  ;;  %v1444_v8 = vunpack.c.l.bf16 %v2331_v62  ;;  %v193_v15 = vor.u32 %v191_v48, %v190_v45 }
  0x2e   :  { %358 = vst [vmem:[#allocation2 + $0x78] sm:$0xf] %v357_v63  ;;  %v336_v9 = vsel %vm2167_vm2, %v194_v60, %v335_v43  ;;  %v185_v11 = vor.u32 %v183_v50, %v182_v61  ;;  %v186_v13 = vrot.slane %v182_v61, 4  ;;  %v110_v14 = vsel %vm2167_vm2, 0, %v109_v3  ;;  %v371_v26 = vld [vmem:[#allocation2 + $0x8c] sm:$0x1] }
  0x2f   :  { %337 = vst [vmem:[#allocation2 + $0x5c] sm:$0x1] %v336_v9  ;;  %v113_v16 = vsel %vm2167_vm2, 0, %v112_v5  ;;  %v236_v17 = vshrl.u32 %v2331_v62, 16  ;;  %v2024_v20 = vpack.i.bf16 %v1444_v8, %v1443_v6  ;;  %v228_v30 = vshrl.u32 %v2327_v55, 16 }
  0x30   :  { %v330_v23 = vsel %vm2167_vm2, %v186_v13, %v329_v53  ;;  %111 = vst [vmem:[#allocation2 + $0x80] sm:$0x1] %v110_v14  ;;  %v231_v31 = vshll.u32 %v2327_v55, 16  ;;  %v365_v36 = vld [vmem:[#allocation2 + $0x84] sm:$0x1]  ;;  %v239_v41 = vshll.u32 %v2331_v62, 16 }
  0x31   :  { %v326_v32 = vld [vmem:[#allocation2 + $0x50] sm:$0xf]  ;;  %331 = vst [vmem:[#allocation2 + $0x54] sm:$0x1] %v330_v23  ;;  %v238_v34 = vrot.slane %v236_v17, 7  ;;  %2025 = vrot.lane.b32.xlu1 %v2024_v20, %s2127_s0  ;;  %v230_v42 = vrot.slane %v228_v30, 7 }
  0x32   :  { %v332_v39 = vld [vmem:[#allocation2 + $0x58] sm:$0xf]  ;;  %v327_v40 = vsel %vm2211_vm5, %v185_v11, %v326_v32  ;;  %114 = vst [vmem:[#allocation2 + $0x88] sm:$0x1] %v113_v16  ;;  %v2360_v50 = vld [vmem:[#allocation3 + $0x2c] sm:$0xf] }
  0x33   :  { %v333_v43 = vsel %vm2211_vm5, %v193_v15, %v332_v39  ;;  %328 = vst [vmem:[#allocation2 + $0x50] sm:$0xf] %v327_v40  ;;  %v242_v44 = vrot.slane %v238_v34, 4  ;;  %v2358_v45 = vld [vmem:[#allocation3 + $0x28] sm:$0xf]  ;;  %v233_v48 = vor.u32 %v231_v31, %v230_v42  ;;  %v234_v49 = vrot.slane %v230_v42, 4 }
  0x34   :  { %334 = vst [vmem:[#allocation2 + $0x58] sm:$0xf] %v333_v43  ;;  %v1439_v52 = vunpack.c.l.bf16 %v2358_v45  ;;  %v196_v53 = vshrl.u32 %v2358_v45, 16  ;;  %v97_v59 = vld [vmem:[#allocation2 + $0x60] sm:$0x1]  ;;  %v204_v61 = vshrl.u32 %v2360_v50, 16  ;;  %v1440_v63 = vunpack.c.l.bf16 %v2360_v50 }
  0x35   :  { %v372_v56 = vsel %vm2167_vm2, %v242_v44, %v371_v26  ;;  %v100_v60 = vld [vmem:[#allocation2 + $0x68] sm:$0x1]  ;;  %v241_v3 = vor.u32 %v239_v41, %v238_v34  ;;  %v366_v5 = vsel %vm2167_vm2, %v234_v49, %v365_v36  ;;  %v98_v9 = vsel %vm2167_vm2, 0, %v97_v59  ;;  %v341_v13 = vld [vmem:[#allocation2 + $0x64] sm:$0x1] }
  0x36   :  { %373 = vst [vmem:[#allocation2 + $0x8c] sm:$0x1] %v372_v56  ;;  %v101_v11 = vsel %vm2167_vm2, 0, %v100_v60  ;;  %v206_v15 = vrot.slane %v204_v61, 7  ;;  %v2014_v16 = vpack.i.bf16 %v1440_v63, %v1439_v52  ;;  %v198_v17 = vrot.slane %v196_v53, 7 }
  0x37   :  { %v362_v14 = vld [vmem:[#allocation2 + $0x80] sm:$0xf]  ;;  %367 = vst [vmem:[#allocation2 + $0x84] sm:$0x1] %v366_v5  ;;  %v207_v23 = vshll.u32 %v2360_v50, 16  ;;  %v199_v30 = vshll.u32 %v2358_v45, 16 }
  0x38   :  { %v363_v20 = vsel %vm2211_vm5, %v233_v48, %v362_v14  ;;  %99 = vst [vmem:[#allocation2 + $0x60] sm:$0x1] %v98_v9  ;;  %v347_v26 = vld [vmem:[#allocation2 + $0x6c] sm:$0x1]  ;;  %v210_v32 = vrot.slane %v206_v15, 4  ;;  %v202_v34 = vrot.slane %v198_v17, 4  ;;  %2015 = vrot.lane.b32.xlu2 %v2014_v16, %s2127_s0 }
  0x39   :  { %v368_v31 = vld [vmem:[#allocation2 + $0x88] sm:$0xf]  ;;  %364 = vst [vmem:[#allocation2 + $0x80] sm:$0xf] %v363_v20  ;;  %v201_v41 = vor.u32 %v199_v30, %v198_v17  ;;  %v209_v42 = vor.u32 %v207_v23, %v206_v15  ;;  %v2128_v53 = vmov 0  }
  0x3a   :  { %v369_v36 = vsel %vm2211_vm5, %v241_v3, %v368_v31  ;;  %102 = vst [vmem:[#allocation2 + $0x68] sm:$0x1] %v101_v11  ;;  %v348_v39 = vsel %vm2167_vm2, %v210_v32, %v347_v26  ;;  %v342_v40 = vsel %vm2167_vm2, %v202_v34, %v341_v13  ;;  %v59_v56 = vld [vmem:[#allocation2 + $0x4] sm:$0x1]  ;;  %v1015_v60 = vld [vmem:[#allocation2 + $0x8] sm:$0xf] }
  0x3b   :  { %370 = vst [vmem:[#allocation2 + $0x88] sm:$0xf] %v369_v36  ;;  %v60_v59 = vsel %vm2167_vm2, 0, %v59_v56  ;;  %v1017_v61 = vld [vmem:[#allocation2 + $0x10] sm:$0xf]  ;;  %v1048_v3 = vshrl.u32 %v1015_v60, 16 }
  0x3c   :  { %349 = vst [vmem:[#allocation2 + $0x6c] sm:$0x1] %v348_v39  ;;  %v1051_v5 = vshll.u32 %v1015_v60, 16  ;;  %v1062_v9 = vshrl.u32 %v1017_v61, 16  ;;  %v1065_v11 = vshll.u32 %v1017_v61, 16  ;;  %v1978_v61 = vld [vmem:[%s2791_s1 + $0x18] sm:$0xff] }
  0x3d   :  { %343 = vst [vmem:[#allocation2 + $0x64] sm:$0x1] %v342_v40  ;;  %v1050_v14 = vrot.slane %v1048_v3, 4  ;;  %v1016_v20 = vld [vmem:[#allocation2 + $0xc] sm:$0x1]  ;;  %1335 = vmatpush.bf16.msra.mxu3 %v1978_v61 }
  0x3e   :  { %55 = vst.msk [vmem:[#allocation2] sm:$0xf] %vm54_vm4, %v2128_v53  ;;  %v1053_v15 = vrot.slane %v1051_v5, 5  ;;  %v1064_v16 = vrot.slane %v1062_v9, 4  ;;  %v1067_v17 = vrot.slane %v1065_v11, 5  ;;  %v1057_v32 = vshll.u32 %v1016_v20, 16 }
  0x3f   :  { %v338_v43 = vld [vmem:[#allocation2 + $0x60] sm:$0xf]  ;;  %62 = vst.msk [vmem:[#allocation2 + $0x48] sm:$0xf] %vm54_vm4, %v2128_v53  ;;  %v1018_v23 = vld [vmem:[#allocation2 + $0x14] sm:$0x1] }
  0x40   :  { %v339_v44 = vsel %vm2211_vm5, %v201_v41, %v338_v43  ;;  %61 = vst [vmem:[#allocation2 + $0x4] sm:$0x1] %v60_v59  ;;  %v1054_v31 = vor.u32 %v1053_v15, %v1050_v14  ;;  %v1068_v34 = vor.u32 %v1067_v17, %v1064_v16  ;;  %v1071_v36 = vshll.u32 %v1018_v23, 16  ;;  %v375_v39 = vld [vmem:[#allocation2 + $0x8] sm:$0xf]  ;;  %v1967_v16 = vld [vmem:[%s2791_s1] sm:$0xff] }
  0x41   :  { %v344_v48 = vld [vmem:[#allocation2 + $0x68] sm:$0xf]  ;;  %340 = vst [vmem:[#allocation2 + $0x60] sm:$0xf] %v339_v44  ;;  %vm408_vm6 = vsmask.f32 3328  ;;  %819 = vmatpush.bf16.msra.mxu1 %v1967_v16 }
  0x42   :  { %v345_v49 = vsel %vm2211_vm5, %v209_v42, %v344_v48  ;;  %vm409_vm7 = vsmask.f32 7440  ;;  %v1055_v43 = vrot.slane %v1054_v31, 4  ;;  %v1059_v44 = vrot.slane %v1057_v32, 5  ;;  %v393_v56 = vld [vmem:[#allocation2 + $0xc] sm:$0x1] }
  0x43   :  { %346 = vst [vmem:[#allocation2 + $0x68] sm:$0xf] %v345_v49  ;;  %vm2400_vm8 = vmor %vm408_vm6, %vm409_vm7  ;;  %v1069_v49 = vrot.slane %v1068_v34, 4  ;;  %v1073_v53 = vrot.slane %v1071_v36, 5  ;;  %v1903_v3 = vld [vmem:[#allocation2 + $0x8] sm:$0xf] }
  0x44   :  { %v1969_v5 = vld [vmem:[#allocation2 + $0xc] sm:$0xf0]  ;;  %v1060_v9 = vsel %vm2400_vm8, %v1055_v43, %v1059_v44  ;;  %v426_v11 = vshrl.u32 %v375_v39, 16  ;;  %v1968_v15 = vld [vmem:[%s2791_s1 + $0x8] sm:$0xff]  ;;  %v435_v31 = vshll.u32 %v393_v56, 16  ;;  %s2129_s1 = smov 120  }
  0x45   :  { %v374_v13 = vld [vmem:[#allocation2] sm:$0xf]  ;;  %v1904_v38 = vor.u32 %v1969_v5, %v1903_v3  ;;  %v1274_v14 = vunpack.c.l.b16 %v1060_v9  ;;  %700 = vmatpush.bf16.msra.mxu0 %v1968_v15  ;;  %v1959_v36 = vld [vmem:[#allocation2 + $0x4] sm:$0xf0]  ;;  %v376_v5 = vld [vmem:[#allocation2 + $0x10] sm:$0xf] }
  0x46   :  { %v412_v26 = vshrl.u32 %v374_v13, 16  ;;  %v415_v30 = vshll.u32 %v374_v13, 16  ;;  %v1074_v13 = vsel %vm2400_vm8, %v1069_v49, %v1073_v53  ;;  %v1857_v34 = vld [vmem:[#allocation2] sm:$0xf]  ;;  %v437_v44 = vrot.slane %v435_v31, 5 }
  0x47   :  { %v392_v40 = vld [vmem:[#allocation2 + $0x4] sm:$0x1]  ;;  %v1275_v17 = vunpack.c.l.b16 %v1074_v13  ;;  %1937 = vmatmul.msk.bf16.vlgmr.msra.gmra.mxu2 %vm668_vm9, %v1904_v38  ;;  %v1019_v49 = vld [vmem:[#allocation2 + $0x18] sm:$0xf]  ;;  %v1021_v53 = vld [vmem:[#allocation2 + $0x20] sm:$0xf] }
  0x48   :  { %v414_v41 = vrot.slane %v412_v26, 4  ;;  %v417_v42 = vrot.slane %v415_v30, 5  ;;  %v421_v60 = vshll.u32 %v392_v40, 16  ;;  %v428_v26 = vrot.slane %v426_v11, 4  ;;  %v1020_v15 = vld [vmem:[#allocation2 + $0x1c] sm:$0x1] }
  0x49   :  { %v429_v30 = vshll.u32 %v375_v39, 16  ;;  %v1290_v32 = vpack.c.b16 %v1275_v17, %v1274_v14  ;;  %v1076_v39 = vshrl.u32 %v1019_v49, 16  ;;  %v1079_v56 = vshll.u32 %v1019_v49, 16  ;;  %v1022_v16 = vld [vmem:[#allocation2 + $0x24] sm:$0x1] }
  0x4a   :  { %v418_v59 = vor.u32 %v417_v42, %v414_v41  ;;  %v423_v23 = vrot.slane %v421_v60, 5  ;;  %v1858_v41 = vor.u32 %v1959_v36, %v1857_v34  ;;  %v1093_v60 = vshll.u32 %v1021_v53, 16  ;;  %v395_v27 = vld [vmem:[#allocation2 + $0x1c] sm:$0x1]  ;;  %v1971_v51 = vld [vmem:[#allocation2 + $0x2c] sm:$0xf0] }
  0x4b   :  { %v431_v40 = vrot.slane %v429_v30, 5  ;;  %1951 = vmatmul.msk.bf16.vlgmr.msra.gmra.mxu3 %vm668_vm9, %v1290_v32  ;;  %v1078_v9 = vrot.slane %v1076_v39, 4  ;;  %v1081_v11 = vrot.slane %v1079_v56, 5  ;;  %v440_v17 = vshrl.u32 %v376_v5, 16  ;;  %v378_v21 = vld [vmem:[#allocation2 + $0x20] sm:$0xf] }
  0x4c   :  { %v419_v20 = vrot.slane %v418_v59, 4  ;;  %1891 = vmatmul.msk.bf16.vlgmr.msra.gmra.mxu1 %vm668_vm9, %v1858_v41  ;;  %v1090_v59 = vshrl.u32 %v1021_v53, 16  ;;  %v1095_v13 = vrot.slane %v1093_v60, 5  ;;  %v1085_v31 = vshll.u32 %v1020_v15, 16  ;;  %v377_v41 = vld [vmem:[#allocation2 + $0x18] sm:$0xf] }
  0x4d   :  { %v432_v43 = vor.u32 %v431_v40, %v428_v26  ;;  %v1082_v30 = vor.u32 %v1081_v11, %v1078_v9  ;;  %v1099_v40 = vshll.u32 %v1022_v16, 16  ;;  %v1970_v9 = vld [vmem:[#allocation2 + $0x1c] sm:$0xf0]  ;;  %v1027_v46 = vld [vmem:[#allocation2 + $0x38] sm:$0xf] }
  0x4e   :  { %v424_v42 = vsel %vm2400_vm8, %v419_v20, %v423_v23  ;;  %v1092_v38 = vrot.slane %v1090_v59, 4  ;;  %v443_v20 = vshll.u32 %v376_v5, 16  ;;  %v1087_v39 = vrot.slane %v1085_v31, 5  ;;  %v1907_v5 = vld [vmem:[#allocation2 + $0x18] sm:$0xf] }
  0x4f   :  { %v433_v61 = vrot.slane %v432_v43, 4  ;;  %v638_v3 = vunpack.c.l.b16 %v424_v42  ;;  %v394_v42 = vld [vmem:[#allocation2 + $0x14] sm:$0x1]  ;;  %v442_v43 = vrot.slane %v440_v17, 4  ;;  %v1083_v53 = vrot.slane %v1082_v30, 4 }
  0x50   :  { %v1096_v32 = vor.u32 %v1095_v13, %v1092_v38  ;;  %v1101_v60 = vrot.slane %v1099_v40, 5  ;;  %v449_v11 = vshll.u32 %v394_v42, 16  ;;  %v454_v38 = vshrl.u32 %v377_v41, 16 }
  0x51   :  { %v438_v14 = vsel %vm2400_vm8, %v433_v61, %v437_v44  ;;  %v445_v61 = vrot.slane %v443_v20, 5 }
  0x52   :  { %v639_v26 = vunpack.c.l.b16 %v438_v14  ;;  %v1097_v56 = vrot.slane %v1096_v32, 4  ;;  %v1908_v14 = vor.u32 %v1970_v9, %v1907_v5  ;;  %v451_v19 = vrot.slane %v449_v11, 5  ;;  %v1025_v9 = vld [vmem:[#allocation2 + $0x30] sm:$0xf]  ;;  %v1911_v11 = vld [vmem:[#allocation2 + $0x28] sm:$0xf] }
  0x53   :  { %v446_v31 = vor.u32 %v445_v61, %v442_v43  ;;  %v1960_v43 = vld [vmem:[#allocation2 + $0x14] sm:$0xf0]  ;;  %v463_v61 = vshll.u32 %v395_v27, 16 }
  0x54   :  { %v654_v49 = vpack.c.b16 %v639_v26, %v638_v3  ;;  %v1088_v3 = vsel %vm2400_vm8, %v1083_v53, %v1087_v39  ;;  %v1102_v2 = vsel %vm2400_vm8, %v1097_v56, %v1101_v60  ;;  %v1023_v39 = vld [vmem:[#allocation2 + $0x28] sm:$0xf] }
  0x55   :  { %v1276_v15 = vunpack.c.l.b16 %v1088_v3  ;;  %v1277_v16 = vunpack.c.l.b16 %v1102_v2  ;;  %v447_v18 = vrot.slane %v446_v31, 4  ;;  %v1026_v31 = vld [vmem:[#allocation2 + $0x34] sm:$0x1] }
  0x56   :  { %1847 = vmatmul.msk.bf16.vlgmr.msra.gmra.mxu0 %vm668_vm9, %v654_v49 }
  0x57   :  { %1938 = vmatmul.msk.bf16.gmra.mxu2 %vm668_vm9, %v1908_v14  ;;  %v1291_v30 = vpack.c.b16 %v1277_v16, %v1276_v15  ;;  %v452_v22 = vsel %vm2400_vm8, %v447_v18, %v451_v19  ;;  %v1107_v14 = vshll.u32 %v1023_v39, 16  ;;  %v1118_v15 = vshrl.u32 %v1025_v9, 16 }
  0x58   :  { %v640_v5 = vunpack.c.l.b16 %v452_v22  ;;  %v1121_v16 = vshll.u32 %v1025_v9, 16 }
  0x5b   :  { %1952 = vmatmul.msk.bf16.gmra.mxu3 %vm668_vm9, %v1291_v30 }
  0x7e   :  { %v2001_v23 = vpop.permute.xlu1 %2000 }
  0x7f   :  { %v2003_v34 = vunpack.i.h.bf16 %v2001_v23  ;;  %v2002_v36 = vunpack.i.l.bf16 %v2001_v23 }
  0x81   :  { %v2426_v44 = vmax.f32 %v1434_v10, %v2003_v34  ;;  %v2430_v59 = vmax.f32 %v1433_v7, %v2002_v36 }
  0x83   :  { %v2039_v36 = vpack.i.bf16 %v2426_v44, %v2430_v59 }
  0x84   :  { %v1991_v13 = vpop.permute.xlu0 %1990 }
  0x85   :  { %v2011_v10 = vpop.permute.xlu2 %2010  ;;  %v1993_v1 = vunpack.i.h.bf16 %v1991_v13  ;;  %v1992_v7 = vunpack.i.l.bf16 %v1991_v13  ;;  %2040 = vrot.lane.b32.xlu1 %v2039_v36, %s2129_s1  ;;  %v1104_v13 = vshrl.u32 %v1023_v39, 16  ;;  %v1109_v36 = vrot.slane %v1107_v14, 5 }
  0x86   :  { %v2013_v17 = vunpack.i.h.bf16 %v2011_v10  ;;  %v2012_v20 = vunpack.i.l.bf16 %v2011_v10 }
  0x87   :  { %v2440_v23 = vmax.f32 %v1430_v33, %v1993_v1  ;;  %v2444_v26 = vmax.f32 %v1429_v24, %v1992_v7  ;;  %v456_v24 = vrot.slane %v454_v38, 4  ;;  %v1912_v38 = vor.u32 %v1971_v51, %v1911_v11 }
  0x88   :  { %v2448_v32 = vmax.f32 %v1438_v35, %v2013_v17  ;;  %v2452_v34 = vmax.f32 %v1437_v28, %v2012_v20  ;;  %v457_v28 = vshll.u32 %v377_v41, 16  ;;  %v1861_v35 = vld [vmem:[#allocation2 + $0x10] sm:$0xf]  ;;  %v1106_v7 = vrot.slane %v1104_v13, 4  ;;  %v397_v13 = vld [vmem:[#allocation2 + $0x2c] sm:$0x1] }
  0x89   :  { %v2029_v56 = vpack.i.bf16 %v2440_v23, %v2444_v26  ;;  %v1862_v3 = vor.u32 %v1960_v43, %v1861_v35  ;;  %1939 = vmatmul.msk.bf16.gmra.mxu2 %vm668_vm9, %v1912_v38 }
  0x8a   :  { %v2006_v33 = vpop.permute.xlu1 %2005  ;;  %v459_v60 = vrot.slane %v457_v28, 5  ;;  %v2049_v41 = vpack.i.bf16 %v2448_v32, %v2452_v34  ;;  %v1110_v43 = vor.u32 %v1109_v36, %v1106_v7 }
  0x8b   :  { %v2008_v40 = vunpack.i.h.bf16 %v2006_v33  ;;  %v2007_v42 = vunpack.i.l.bf16 %v2006_v33  ;;  %2030 = vrot.lane.b32.xlu2 %v2029_v56, %s2129_s1  ;;  %1892 = vmatmul.msk.bf16.gmra.mxu1 %vm668_vm9, %v1862_v3  ;;  %v1127_v56 = vshll.u32 %v1026_v31, 16 }
  0x8c   :  { %v460_v37 = vor.u32 %v459_v60, %v456_v24  ;;  %v1120_v24 = vrot.slane %v1118_v15, 4 }
  0x8d   :  { %v2462_v49 = vmax.f32 %v1436_v57, %v2008_v40  ;;  %v2466_v53 = vmax.f32 %v1435_v47, %v2007_v42  ;;  %v1024_v57 = vld [vmem:[#allocation2 + $0x2c] sm:$0x1]  ;;  %v465_v47 = vrot.slane %v463_v61, 5  ;;  %v1123_v40 = vrot.slane %v1121_v16, 5  ;;  %v1961_v16 = vld [vmem:[#allocation2 + $0x24] sm:$0xf0] }
  0x8e   :  { %v1113_v2 = vshll.u32 %v1024_v57, 16  ;;  %v461_v1 = vrot.slane %v460_v37, 4  ;;  %v1129_v9 = vrot.slane %v1127_v56, 5  ;;  %v379_v57 = vld [vmem:[#allocation2 + $0x28] sm:$0xf]  ;;  %v1132_v56 = vshrl.u32 %v1027_v46, 16 }
  0x8f   :  { %v2044_v30 = vpack.i.bf16 %v2462_v49, %v2466_v53  ;;  %v1124_v39 = vor.u32 %v1123_v40, %v1120_v24  ;;  %v396_v37 = vld [vmem:[#allocation2 + $0x24] sm:$0x1]  ;;  %v482_v31 = vshrl.u32 %v379_v57, 16  ;;  %v485_v36 = vshll.u32 %v379_v57, 16 }
  0x90   :  { %v1996_v10 = vpop.permute.xlu0 %1995  ;;  %v466_v33 = vsel %vm2400_vm8, %v461_v1, %v465_v47  ;;  %v1115_v18 = vrot.slane %v1113_v2, 5  ;;  %v1865_v2 = vld [vmem:[#allocation2 + $0x20] sm:$0xf] }
  0x91   :  { %v1998_v17 = vunpack.i.h.bf16 %v1996_v10  ;;  %v1997_v20 = vunpack.i.l.bf16 %v1996_v10  ;;  %v641_v35 = vunpack.c.l.b16 %v466_v33  ;;  %v487_v24 = vrot.slane %v485_v36, 5  ;;  %v381_v36 = vld [vmem:[#allocation2 + $0x38] sm:$0xf] }
  0x92   :  { %v2016_v19 = vpop.permute.xlu2 %2015  ;;  %v1866_v40 = vor.u32 %v1961_v16, %v1865_v2 }
  0x93   :  { %v2018_v42 = vunpack.i.h.bf16 %v2016_v19  ;;  %v2017_v27 = vunpack.i.l.bf16 %v2016_v19  ;;  %v2480_v22 = vmax.f32 %v1432_v29, %v1998_v17  ;;  %v2484_v28 = vmax.f32 %v1431_v25, %v1997_v20  ;;  %2045 = vrot.lane.b32.xlu2 %v2044_v30, %s2129_s1  ;;  %v1915_v17 = vld [vmem:[#allocation2 + $0x38] sm:$0xf]  ;;  %v1972_v19 = vld [vmem:[#allocation2 + $0x3c] sm:$0xf0] }
  0x94   :  { %v655_v12 = vpack.c.b16 %v641_v35, %v640_v5  ;;  %v1111_v25 = vrot.slane %v1110_v43, 4  ;;  %v1125_v29 = vrot.slane %v1124_v39, 4  ;;  %v477_v30 = vshll.u32 %v396_v37, 16 }
  0x95   :  { %v2488_v60 = vmax.f32 %v1440_v63, %v2018_v42  ;;  %v2492_v61 = vmax.f32 %v1439_v52, %v2017_v27  ;;  %v468_v52 = vshrl.u32 %v378_v21, 16  ;;  %v471_v63 = vshll.u32 %v378_v21, 16  ;;  %v1029_v42 = vld [vmem:[#allocation2 + $0x40] sm:$0xf] }
  0x96   :  { %1848 = vmatmul.msk.bf16.gmra.mxu0 %vm668_vm9, %v655_v12  ;;  %v1116_v50 = vsel %vm2400_vm8, %v1111_v25, %v1115_v18  ;;  %v1130_v45 = vsel %vm2400_vm8, %v1125_v29, %v1129_v9  ;;  %v2034_v5 = vpack.i.bf16 %v2480_v22, %v2484_v28  ;;  %v479_v33 = vrot.slane %v477_v30, 5  ;;  %v1030_v29 = vld [vmem:[#allocation2 + $0x44] sm:$0x1] }
  0x97   :  { %v1278_v47 = vunpack.c.l.b16 %v1116_v50  ;;  %v1279_v38 = vunpack.c.l.b16 %v1130_v45  ;;  %v470_v14 = vrot.slane %v468_v52, 4  ;;  %v2054_v7 = vpack.i.bf16 %v2488_v60, %v2492_v61 }
  0x98   :  { %v2021_v3 = vpop.permute.xlu0 %2020  ;;  %v473_v15 = vrot.slane %v471_v63, 5  ;;  %2035 = vrot.lane.b32.xlu0 %v2034_v5, %s2129_s1  ;;  %v484_v18 = vrot.slane %v482_v31, 4  ;;  %v1916_v39 = vor.u32 %v1972_v19, %v1915_v17  ;;  %v1135_v21 = vshll.u32 %v1027_v46, 16  ;;  %v398_v17 = vld [vmem:[#allocation2 + $0x34] sm:$0x1] }
  0x99   :  { %v2023_v11 = vunpack.i.h.bf16 %v2021_v3  ;;  %v2022_v51 = vunpack.i.l.bf16 %v2021_v3  ;;  %v1292_v20 = vpack.c.b16 %v1279_v38, %v1278_v47  ;;  %2055 = vrot.lane.b32.xlu1 %v2054_v7, %s2129_s1  ;;  %v1146_v3 = vshrl.u32 %v1029_v42, 16 }
  0x9a   :  { %v474_v54 = vor.u32 %v473_v15, %v470_v14  ;;  %v488_v43 = vor.u32 %v487_v24, %v484_v18  ;;  %v1134_v63 = vrot.slane %v1132_v56, 4  ;;  %v1149_v14 = vshll.u32 %v1029_v42, 16  ;;  %1940 = vmatmul.msk.bf16.gmra.mxu2 %vm668_vm9, %v1916_v39  ;;  %v1973_v42 = vld [vmem:[#allocation2 + $0x54] sm:$0xf0]  ;;  %v1031_v56 = vld [vmem:[#allocation2 + $0x50] sm:$0xf] }
  0x9b   :  { %v2505_v10 = vmax.f32 %v1442_v4, %v2023_v11  ;;  %v2509_v1 = vmax.f32 %v1441_v58, %v2022_v51  ;;  %v491_v4 = vshll.u32 %v397_v13, 16  ;;  %v1028_v58 = vld [vmem:[#allocation2 + $0x3c] sm:$0x1]  ;;  %1953 = vmatmul.msk.bf16.gmra.mxu3 %vm668_vm9, %v1292_v20  ;;  %1893 = vmatmul.msk.bf16.gmra.mxu1 %vm668_vm9, %v1866_v40  ;;  %v1137_v11 = vrot.slane %v1135_v21, 5  ;;  %v380_v51 = vld [vmem:[#allocation2 + $0x30] sm:$0xf] }
  0x9c   :  { %v475_v27 = vrot.slane %v474_v54, 4  ;;  %v1141_v9 = vshll.u32 %v1028_v58, 16  ;;  %v489_v45 = vrot.slane %v488_v43, 4  ;;  %v1148_v47 = vrot.slane %v1146_v3, 4  ;;  %v1869_v58 = vld [vmem:[#allocation2 + $0x30] sm:$0xf] }
  0x9d   :  { %v493_v35 = vrot.slane %v491_v4, 5  ;;  %v2059_v12 = vpack.i.bf16 %v2505_v10, %v2509_v1  ;;  %v1138_v13 = vor.u32 %v1137_v11, %v1134_v63  ;;  %v1155_v2 = vshll.u32 %v1030_v29, 16  ;;  %v399_v4 = vld [vmem:[#allocation2 + $0x3c] sm:$0x1]  ;;  %v1919_v40 = vld [vmem:[#allocation2 + $0x50] sm:$0xf] }
  0x9e   :  { %v480_v25 = vsel %vm2400_vm8, %v475_v27, %v479_v33  ;;  %v1143_v5 = vrot.slane %v1141_v9, 5  ;;  %v496_v20 = vshrl.u32 %v380_v51, 16  ;;  %v1151_v30 = vrot.slane %v1149_v14, 5  ;;  %v1962_v33 = vld [vmem:[#allocation2 + $0x34] sm:$0xf0] }
  0x9f   :  { %v642_v52 = vunpack.c.l.b16 %v480_v25  ;;  %2060 = vrot.lane.b32.xlu2 %v2059_v12, %s2129_s1  ;;  %v494_v38 = vsel %vm2400_vm8, %v489_v45, %v493_v35  ;;  %v1157_v31 = vrot.slane %v1155_v2, 5  ;;  %v499_v19 = vshll.u32 %v380_v51, 16  ;;  %v1032_v9 = vld [vmem:[#allocation2 + $0x54] sm:$0x1]  ;;  %v1033_v3 = vld [vmem:[#allocation2 + $0x58] sm:$0xf] }
  0xa0   :  { %2050 = vrot.lane.b32.xlu0 %v2049_v41, %s2129_s1  ;;  %v643_v16 = vunpack.c.l.b16 %v494_v38  ;;  %v1139_v41 = vrot.slane %v1138_v13, 4  ;;  %v498_v46 = vrot.slane %v496_v20, 4  ;;  %v510_v24 = vshrl.u32 %v381_v36, 16  ;;  %v63_v2 = vld [vmem:[#allocation2 + $0x4c] sm:$0x1] }
  0xa1   :  { %v501_v55 = vrot.slane %v499_v19, 5  ;;  %v513_v39 = vshll.u32 %v381_v36, 16  ;;  %v519_v25 = vshll.u32 %v399_v4, 16  ;;  %v1870_v29 = vor.u32 %v1962_v33, %v1869_v58 }
  0xa2   :  { %v656_v54 = vpack.c.b16 %v643_v16, %v642_v52  ;;  %v1144_v62 = vsel %vm2400_vm8, %v1139_v41, %v1143_v5  ;;  %v512_v12 = vrot.slane %v510_v24, 4  ;;  %v1920_v63 = vor.u32 %v1973_v42, %v1919_v40  ;;  %v382_v16 = vld [vmem:[#allocation2 + $0x48] sm:$0xf] }
  0xa3   :  { %v2026_v50 = vpop.permute.xlu1 %2025  ;;  %v1280_v18 = vunpack.c.l.b16 %v1144_v62  ;;  %v502_v35 = vor.u32 %v501_v55, %v498_v46  ;;  %v515_v52 = vrot.slane %v513_v39, 5  ;;  %v521_v51 = vrot.slane %v519_v25, 5  ;;  %v401_v55 = vld [vmem:[#allocation2 + $0x54] sm:$0x1] }
  0xa4   :  { %v2028_v57 = vunpack.i.h.bf16 %v2026_v50  ;;  %v2027_v37 = vunpack.i.l.bf16 %v2026_v50  ;;  %v1163_v5 = vshll.u32 %v1031_v56, 16  ;;  %v1169_v13 = vshll.u32 %v1032_v9, 16 }
  0xa5   :  { %v503_v45 = vrot.slane %v502_v35, 4  ;;  %v516_v38 = vor.u32 %v515_v52, %v512_v12  ;;  %v1174_v14 = vshrl.u32 %v1033_v3, 16  ;;  %v1177_v4 = vshll.u32 %v1033_v3, 16  ;;  %v1035_v12 = vld [vmem:[#allocation2 + $0x60] sm:$0xf] }
  0xa6   :  { %v2530_v7 = vmax.f32 %v1444_v8, %v2028_v57  ;;  %v2534_v15 = vmax.f32 %v1443_v6, %v2027_v37  ;;  %v1152_v8 = vor.u32 %v1151_v30, %v1148_v47  ;;  %v505_v6 = vshll.u32 %v398_v17, 16  ;;  %1849 = vmatmul.msk.bf16.gmra.mxu0 %vm668_vm9, %v656_v54  ;;  %v1034_v57 = vld [vmem:[#allocation2 + $0x5c] sm:$0x1]  ;;  %v1873_v52 = vld [vmem:[#allocation2 + $0x48] sm:$0xf] }
  0xa7   :  { %v1160_v37 = vshrl.u32 %v1031_v56, 16  ;;  %v1165_v30 = vrot.slane %v1163_v5, 5  ;;  %v517_v36 = vrot.slane %v516_v38, 4  ;;  %v1171_v19 = vrot.slane %v1169_v13, 5 }
  0xa8   :  { %v1153_v27 = vrot.slane %v1152_v8, 4  ;;  %v507_v43 = vrot.slane %v505_v6, 5  ;;  %v2064_v21 = vpack.i.bf16 %v2530_v7, %v2534_v15  ;;  %v1176_v54 = vrot.slane %v1174_v14, 4  ;;  %v384_v14 = vld [vmem:[#allocation2 + $0x58] sm:$0xf] }
  0xa9   :  { %v1162_v41 = vrot.slane %v1160_v37, 4  ;;  %v1183_v62 = vshll.u32 %v1034_v57, 16  ;;  %v64_v8 = vsel %vm2167_vm2, 0, %v63_v2  ;;  %v524_v6 = vshrl.u32 %v382_v16, 16 }
  0xaa   :  { %v1158_v50 = vsel %vm2400_vm8, %v1153_v27, %v1157_v31  ;;  %2065 = vrot.lane.b32.xlu0 %v2064_v21, %s2129_s1  ;;  %v508_v47 = vsel %vm2400_vm8, %v503_v45, %v507_v43  ;;  %v383_v31 = vld [vmem:[#allocation2 + $0x50] sm:$0xf]  ;;  %v522_v58 = vsel %vm2400_vm8, %v517_v36, %v521_v51  ;;  %v1179_v33 = vrot.slane %v1177_v4, 5  ;;  %65 = vst [vmem:[#allocation2 + $0x4c] sm:$0x1] %v64_v8 }
  0xab   :  { %v1281_v11 = vunpack.c.l.b16 %v1158_v50  ;;  %v644_v20 = vunpack.c.l.b16 %v508_v47  ;;  %1894 = vmatmul.msk.bf16.gmra.mxu1 %vm668_vm9, %v1870_v29  ;;  %v1166_v46 = vor.u32 %v1165_v30, %v1162_v41  ;;  %v538_v24 = vshrl.u32 %v383_v31, 16  ;;  %1941 = vmatmul.msk.bf16.gmra.mxu2 %vm668_vm9, %v1920_v63  ;;  %v1037_v45 = vld [vmem:[#allocation2 + $0x68] sm:$0xf]  ;;  %v1036_v51 = vld [vmem:[#allocation2 + $0x64] sm:$0x1] }
  0xac   :  { %v645_v40 = vunpack.c.l.b16 %v522_v58  ;;  %v1185_v27 = vrot.slane %v1183_v62, 5  ;;  %v526_v35 = vrot.slane %v524_v6, 4  ;;  %v1180_v43 = vor.u32 %v1179_v33, %v1176_v54  ;;  %v1038_v63 = vld [vmem:[#allocation2 + $0x6c] sm:$0x1]  ;;  %v385_v58 = vld [vmem:[#allocation2 + $0x60] sm:$0xf] }
  0xad   :  { %v1293_v17 = vpack.c.b16 %v1281_v11, %v1280_v18  ;;  %v527_v18 = vshll.u32 %v382_v16, 16  ;;  %v1167_v42 = vrot.slane %v1166_v46, 4  ;;  %v540_v56 = vrot.slane %v538_v24, 4  ;;  %v1963_v11 = vld [vmem:[#allocation2 + $0x4c] sm:$0xf0] }
  0xae   :  { %v541_v21 = vshll.u32 %v383_v31, 16  ;;  %v657_v0 = vpack.c.b16 %v645_v40, %v644_v20  ;;  %v547_v29 = vshll.u32 %v401_v55, 16  ;;  %v1181_v9 = vrot.slane %v1180_v43, 4 }
  0xaf   :  { %1954 = vmatmul.msk.bf16.gmra.mxu3 %vm668_vm9, %v1293_v17  ;;  %v529_v39 = vrot.slane %v527_v18, 5  ;;  %v1172_v25 = vsel %vm2400_vm8, %v1167_v42, %v1171_v19  ;;  %v1188_v57 = vshrl.u32 %v1035_v12, 16  ;;  %v1191_v37 = vshll.u32 %v1035_v12, 16 }
  0xb0   :  { %v543_v50 = vrot.slane %v541_v21, 5  ;;  %v1186_v5 = vsel %vm2400_vm8, %v1181_v9, %v1185_v27  ;;  %v1282_v47 = vunpack.c.l.b16 %v1172_v25  ;;  %v549_v13 = vrot.slane %v547_v29, 5  ;;  %v1923_v27 = vld [vmem:[#allocation2 + $0x60] sm:$0xf] }
  0xb1   :  { %v530_v3 = vor.u32 %v529_v39, %v526_v35  ;;  %v1283_v2 = vunpack.c.l.b16 %v1186_v5  ;;  %v400_v16 = vld [vmem:[#allocation2 + $0x4c] sm:$0x1]  ;;  %v1190_v17 = vrot.slane %v1188_v57, 4  ;;  %v1193_v20 = vrot.slane %v1191_v37, 5  ;;  %v1974_v35 = vld [vmem:[#allocation2 + $0x64] sm:$0xf0] }
  0xb2   :  { %v544_v38 = vor.u32 %v543_v50, %v540_v56  ;;  %v1202_v41 = vshrl.u32 %v1037_v45, 16  ;;  %v533_v31 = vshll.u32 %v400_v16, 16  ;;  %v1205_v19 = vshll.u32 %v1037_v45, 16 }
  0xb3   :  { %v531_v30 = vrot.slane %v530_v3, 4  ;;  %v1194_v54 = vor.u32 %v1193_v20, %v1190_v17  ;;  %v1197_v4 = vshll.u32 %v1036_v51, 16  ;;  %v1211_v62 = vshll.u32 %v1038_v63, 16  ;;  %v403_v51 = vld [vmem:[#allocation2 + $0x64] sm:$0x1] }
  0xb4   :  { %v545_v36 = vrot.slane %v544_v38, 4  ;;  %v1204_v46 = vrot.slane %v1202_v41, 4  ;;  %v535_v8 = vrot.slane %v533_v31, 5  ;;  %v1874_v55 = vor.u32 %v1963_v11, %v1873_v52  ;;  %v402_v52 = vld [vmem:[#allocation2 + $0x5c] sm:$0x1] }
  0xb5   :  { %v1207_v6 = vrot.slane %v1205_v19, 5  ;;  %v552_v33 = vshrl.u32 %v384_v14, 16  ;;  %v1294_v18 = vpack.c.b16 %v1283_v2, %v1282_v47  ;;  %v555_v24 = vshll.u32 %v384_v14, 16  ;;  %v1877_v41 = vld [vmem:[#allocation2 + $0x58] sm:$0xf] }
  0xb6   :  { %1850 = vmatmul.msk.bf16.gmra.mxu0 %vm668_vm9, %v657_v0  ;;  %v536_v40 = vsel %vm2400_vm8, %v531_v30, %v535_v8  ;;  %v550_v42 = vsel %vm2400_vm8, %v545_v36, %v549_v13  ;;  %v1195_v39 = vrot.slane %v1194_v54, 4  ;;  %v1199_v56 = vrot.slane %v1197_v4, 5  ;;  %v1964_v30 = vld [vmem:[#allocation2 + $0x5c] sm:$0xf0]  ;;  %v1039_v19 = vld [vmem:[#allocation2 + $0x70] sm:$0xf] }
  0xb7   :  { %v1208_v43 = vor.u32 %v1207_v6, %v1204_v46  ;;  %v1213_v21 = vrot.slane %v1211_v62, 5  ;;  %v566_v12 = vshrl.u32 %v385_v58, 16  ;;  %v554_v25 = vrot.slane %v552_v33, 4  ;;  %v1041_v54 = vld [vmem:[#allocation2 + $0x78] sm:$0xf] }
  0xb8   :  { %v557_v29 = vrot.slane %v555_v24, 5  ;;  %v569_v9 = vshll.u32 %v385_v58, 16  ;;  %v646_v3 = vunpack.c.l.b16 %v536_v40  ;;  %v647_v50 = vunpack.c.l.b16 %v550_v42  ;;  %v386_v58 = vld [vmem:[#allocation2 + $0x68] sm:$0xf] }
  0xb9   :  { %v1209_v0 = vrot.slane %v1208_v43, 4  ;;  %v1924_v45 = vor.u32 %v1974_v35, %v1923_v27  ;;  %v568_v11 = vrot.slane %v566_v12, 4  ;;  %v1200_v37 = vsel %vm2400_vm8, %v1195_v39, %v1199_v56  ;;  %v1040_v35 = vld [vmem:[#allocation2 + $0x74] sm:$0x1]  ;;  %v1042_v43 = vld [vmem:[#allocation2 + $0x7c] sm:$0x1] }
  0xba   :  { %v571_v57 = vrot.slane %v569_v9, 5  ;;  %v558_v47 = vor.u32 %v557_v29, %v554_v25  ;;  %v561_v38 = vshll.u32 %v402_v52, 16  ;;  %v658_v13 = vpack.c.b16 %v647_v50, %v646_v3  ;;  %v1927_v29 = vld [vmem:[#allocation2 + $0x70] sm:$0xf]  ;;  %v1975_v9 = vld [vmem:[#allocation2 + $0x74] sm:$0xf0] }
  0xbb   :  { %1895 = vmatmul.msk.bf16.gmra.mxu1 %vm668_vm9, %v1874_v55  ;;  %v1214_v5 = vsel %vm2400_vm8, %v1209_v0, %v1213_v21  ;;  %1942 = vmatmul.msk.bf16.gmra.mxu2 %vm668_vm9, %v1924_v45  ;;  %v575_v14 = vshll.u32 %v403_v51, 16  ;;  %v1284_v2 = vunpack.c.l.b16 %v1200_v37  ;;  %v1216_v4 = vshrl.u32 %v1039_v19, 16  ;;  %v387_v3 = vld [vmem:[#allocation2 + $0x70] sm:$0xf] }
  0xbc   :  { %v572_v63 = vor.u32 %v571_v57, %v568_v11  ;;  %v1285_v16 = vunpack.c.l.b16 %v1214_v5  ;;  %v559_v17 = vrot.slane %v558_v47, 4  ;;  %v563_v20 = vrot.slane %v561_v38, 5  ;;  %v404_v5 = vld [vmem:[#allocation2 + $0x6c] sm:$0x1] }
  0xbd   :  { %v577_v36 = vrot.slane %v575_v14, 5  ;;  %v1219_v46 = vshll.u32 %v1039_v19, 16  ;;  %v1230_v62 = vshrl.u32 %v1041_v54, 16  ;;  %v1233_v8 = vshll.u32 %v1041_v54, 16  ;;  %v405_v14 = vld [vmem:[#allocation2 + $0x74] sm:$0x1] }
  0xbe   :  { %v573_v31 = vrot.slane %v572_v63, 4  ;;  %v1295_v55 = vpack.c.b16 %v1285_v16, %v1284_v2  ;;  %v1878_v6 = vor.u32 %v1964_v30, %v1877_v41  ;;  %v1218_v33 = vrot.slane %v1216_v4, 4 }
  0xbf   :  { %1955 = vmatmul.msk.bf16.gmra.mxu3 %vm668_vm9, %v1294_v18  ;;  %v1221_v18 = vrot.slane %v1219_v46, 5  ;;  %v1232_v24 = vrot.slane %v1230_v62, 4  ;;  %v1235_v40 = vrot.slane %v1233_v8, 5  ;;  %v564_v42 = vsel %vm2400_vm8, %v559_v17, %v563_v20  ;;  %v1881_v46 = vld [vmem:[#allocation2 + $0x68] sm:$0xf] }
  0xc0   :  { %v578_v27 = vsel %vm2400_vm8, %v573_v31, %v577_v36  ;;  %v580_v39 = vshrl.u32 %v386_v58, 16  ;;  %v583_v56 = vshll.u32 %v386_v58, 16  ;;  %v1225_v12 = vshll.u32 %v1040_v35, 16  ;;  %v1965_v62 = vld [vmem:[#allocation2 + $0x6c] sm:$0xf0] }
  0xc1   :  { %v1222_v21 = vor.u32 %v1221_v18, %v1218_v33  ;;  %v1236_v0 = vor.u32 %v1235_v40, %v1232_v24  ;;  %v1239_v25 = vshll.u32 %v1042_v43, 16  ;;  %v648_v50 = vunpack.c.l.b16 %v564_v42 }
  0xc2   :  { %v649_v45 = vunpack.c.l.b16 %v578_v27  ;;  %v1928_v52 = vor.u32 %v1975_v9, %v1927_v29  ;;  %v1227_v51 = vrot.slane %v1225_v12, 5  ;;  %v582_v47 = vrot.slane %v580_v39, 4  ;;  %v1045_v12 = vld [vmem:[#allocation2 + $0x88] sm:$0xf] }
  0xc3   :  { %v1223_v11 = vrot.slane %v1222_v21, 4  ;;  %v1237_v57 = vrot.slane %v1236_v0, 4  ;;  %v1241_v37 = vrot.slane %v1239_v25, 5  ;;  %v585_v38 = vrot.slane %v583_v56, 5  ;;  %v1043_v21 = vld [vmem:[#allocation2 + $0x80] sm:$0xf] }
  0xc4   :  { %v597_v63 = vshll.u32 %v387_v3, 16  ;;  %v659_v17 = vpack.c.b16 %v649_v45, %v648_v50  ;;  %v589_v41 = vshll.u32 %v404_v5, 16  ;;  %v603_v19 = vshll.u32 %v405_v14, 16  ;;  %v388_v45 = vld [vmem:[#allocation2 + $0x78] sm:$0xf] }
  0xc5   :  { %v1228_v20 = vsel %vm2400_vm8, %v1223_v11, %v1227_v51  ;;  %v1242_v30 = vsel %vm2400_vm8, %v1237_v57, %v1241_v37  ;;  %v586_v31 = vor.u32 %v585_v38, %v582_v47  ;;  %v1882_v33 = vor.u32 %v1965_v62, %v1881_v46  ;;  %v1044_v38 = vld [vmem:[#allocation2 + $0x84] sm:$0x1] }
  0xc6   :  { %1851 = vmatmul.msk.bf16.gmra.mxu0 %vm668_vm9, %v658_v13  ;;  %v594_v13 = vshrl.u32 %v387_v3, 16  ;;  %v599_v16 = vrot.slane %v597_v63, 5  ;;  %v1286_v54 = vunpack.c.l.b16 %v1228_v20  ;;  %v1287_v4 = vunpack.c.l.b16 %v1242_v30 }
  0xc7   :  { %v587_v8 = vrot.slane %v586_v31, 4  ;;  %v605_v58 = vrot.slane %v603_v19, 5  ;;  %v1244_v0 = vshrl.u32 %v1043_v21, 16  ;;  %v1247_v25 = vshll.u32 %v1043_v21, 16 }
  0xc8   :  { %v596_v2 = vrot.slane %v594_v13, 4  ;;  %v1296_v18 = vpack.c.b16 %v1287_v4, %v1286_v54  ;;  %v1258_v29 = vshrl.u32 %v1045_v12, 16  ;;  %v1261_v9 = vshll.u32 %v1045_v12, 16  ;;  %v1046_v13 = vld [vmem:[#allocation2 + $0x8c] sm:$0x1] }
  0xc9   :  { %v1246_v11 = vrot.slane %v1244_v0, 4  ;;  %v1249_v51 = vrot.slane %v1247_v25, 5  ;;  %v608_v63 = vshrl.u32 %v388_v45, 16  ;;  %v611_v14 = vshll.u32 %v388_v45, 16 }
  0xca   :  { %v600_v36 = vor.u32 %v599_v16, %v596_v2  ;;  %v1260_v57 = vrot.slane %v1258_v29, 4  ;;  %v1263_v37 = vrot.slane %v1261_v9, 5 }
  0xcb   :  { %1896 = vmatmul.msk.bf16.gmra.mxu1 %vm668_vm9, %v1878_v6  ;;  %1943 = vmatmul.msk.bf16.gmra.mxu2 %vm668_vm9, %v1928_v52  ;;  %v2595_v52 = vld [vmem:[%s2793_s3] ss:$0 sm:$0xff]  ;;  %v1250_v2 = vor.u32 %v1249_v51, %v1246_v11  ;;  %v610_v30 = vrot.slane %v608_v63, 4  ;;  %v613_v31 = vrot.slane %v611_v14, 5  ;;  %s2130_s3 = smov 12  }
  0xcc   :  { %v601_v6 = vrot.slane %v600_v36, 4  ;;  %v1264_v16 = vor.u32 %v1263_v37, %v1260_v57  ;;  %v1966_v51 = vld [vmem:[#allocation2 + $0x7c] sm:$0xf0]  ;;  %v821_v57 = vpop.f32.mrf.mxu1  ;;  %v959_v37 = vpop.f32.mrf.mxu2 }
  0xcd   :  { %v1251_v36 = vrot.slane %v1250_v2, 4 }
  0xce   :  { %v606_v40 = vsel %vm2400_vm8, %v601_v6, %v605_v58  ;;  %v1265_v54 = vrot.slane %v1264_v16, 4  ;;  %v1976_v6 = vld [vmem:[#allocation2 + $0x84] sm:$0xf0] }
  0xcf   :  { %1956 = vmatmul.msk.bf16.gmra.mxu3 %vm668_vm9, %v1295_v55  ;;  %v591_v55 = vrot.slane %v589_v41, 5  ;;  %v651_v27 = vunpack.c.l.b16 %v606_v40  ;;  %v2600_v41 = vld [vmem:[%s2794_s4] ss:$0 sm:$0xff] }
  0xd0   :  { %v389_v40 = vld [vmem:[#allocation2 + $0x80] sm:$0xf] }
  0xd1   :  { %v592_v24 = vsel %vm2400_vm8, %v587_v8, %v591_v55  ;;  %v406_v8 = vld [vmem:[#allocation2 + $0x7c] sm:$0x1]  ;;  %v1931_v55 = vld [vmem:[#allocation2 + $0x80] sm:$0xf]  ;;  %v622_v29 = vshrl.u32 %v389_v40, 16  ;;  %v625_v9 = vshll.u32 %v389_v40, 16 }
  0xd2   :  { %v650_v42 = vunpack.c.l.b16 %v592_v24  ;;  %v617_v21 = vshll.u32 %v406_v8, 16 }
  0xd4   :  { %v660_v35 = vpack.c.b16 %v651_v27, %v650_v42  ;;  %v614_v42 = vor.u32 %v613_v31, %v610_v30 }
  0xd6   :  { %1852 = vmatmul.msk.bf16.gmra.mxu0 %vm668_vm9, %v659_v17  ;;  %v615_v45 = vrot.slane %v614_v42, 4 }
  0xdb   :  { %1897 = vmatmul.msk.bf16.gmra.mxu1 %vm668_vm9, %v1882_v33 }
  0xdf   :  { %1957 = vmatmul.msk.bf16.gmra.mxu3 %vm668_vm9, %v1296_v18 }
  0xe5   :  { %v2031_v43 = vpop.permute.xlu2 %2030 }
  0xe6   :  { %v2033_v39 = vunpack.i.h.bf16 %v2031_v43  ;;  %v2032_v56 = vunpack.i.l.bf16 %v2031_v43  ;;  %1853 = vmatmul.msk.bf16.gmra.mxu0 %vm668_vm9, %v660_v35  ;;  %v1932_v35 = vor.u32 %v1976_v6, %v1931_v55 }
  0xe8   :  { %v1622_v3 = vmax.f32 %v2440_v23, %v2033_v39  ;;  %v1621_v50 = vmax.f32 %v2444_v26, %v2032_v56  ;;  %v1253_v23 = vshll.u32 %v1044_v38, 16  ;;  %v1267_v26 = vshll.u32 %v1046_v13, 16  ;;  %v407_v56 = vld [vmem:[#allocation2 + $0x84] sm:$0x1]  ;;  %1944 = vmatmul.msk.bf16.gmra.mxu2 %vm668_vm9, %v1932_v35 }
  0xe9   :  { %v631_v11 = vshll.u32 %v407_v56, 16  ;;  %v627_v38 = vrot.slane %v625_v9, 5 }
  0xea   :  { %v1638_v5 = vpack.c.bf16 %v1622_v3, %v1622_v3  ;;  %v1637_v47 = vpack.c.bf16 %v1621_v50, %v1621_v50  ;;  %v1255_v19 = vrot.slane %v1253_v23, 5  ;;  %v1269_v4 = vrot.slane %v1267_v26, 5  ;;  %v1885_v3 = vld [vmem:[#allocation2 + $0x78] sm:$0xf]  ;;  %v1337_v23 = vpop.f32.mrf.mxu3 }
  0xeb   :  { %v1886_v13 = vor.u32 %v1966_v51, %v1885_v3  ;;  %v633_v2 = vrot.slane %v631_v11, 5 }
  0xec   :  { %v1654_v17 = vunpack.c.l.bf16 %v1638_v5  ;;  %v1653_v20 = vunpack.c.l.bf16 %v1637_v47  ;;  %v1256_v58 = vsel %vm2400_vm8, %v1251_v36, %v1255_v19  ;;  %v1270_v33 = vsel %vm2400_vm8, %v1265_v54, %v1269_v4  ;;  %v702_v4 = vpop.f32.mrf.mxu0 }
  0xed   :  { %v2046_v27 = vpop.permute.xlu2 %2045  ;;  %v1288_v43 = vunpack.c.l.b16 %v1256_v58  ;;  %v1289_v39 = vunpack.c.l.b16 %v1270_v33  ;;  %v619_v5 = vrot.slane %v617_v21, 5  ;;  %v624_v47 = vrot.slane %v622_v29, 4  ;;  %1898 = vmatmul.msk.bf16.gmra.mxu1 %vm668_vm9, %v1886_v13 }
  0xee   :  { %v1674_v46 = vmul.f32 %v2595_v52, %v1654_v17  ;;  %v1673_v62 = vmul.f32 %v2595_v52, %v1653_v20  ;;  %v2048_v50 = vunpack.i.h.bf16 %v2046_v27 }
  0xef   :  { %v1297_v25 = vpack.c.b16 %v1289_v39, %v1288_v43  ;;  %v628_v63 = vor.u32 %v627_v38, %v624_v47  ;;  %v620_v17 = vsel %vm2400_vm8, %v615_v45, %v619_v5 }
  0xf0   :  { %v1694_v18 = vadd.f32 %v2600_v41, %v1674_v46  ;;  %v1693_v24 = vadd.f32 %v2600_v41, %v1673_v62  ;;  %v1628_v16 = vmax.f32 %v2462_v49, %v2048_v50  ;;  %v652_v36 = vunpack.c.l.b16 %v620_v17  ;;  %v2621_v46 = vpop.f32.mrf.mxu2  ;;  %v2623_v49 = vpop.f32.mrf.mxu1 }
  0xf1   :  { %1958 = vmatmul.msk.bf16.gmra.mxu3 %vm668_vm9, %v1297_v25  ;;  %v629_v20 = vrot.slane %v628_v63, 4  ;;  %v822_v62 = vadd.f32 %v821_v57, %v702_v4 }
  0xf2   :  { %v1710_v12 = vmax.f32 %v1694_v18, 0.0  ;;  %v1709_v0 = vmax.f32 %v1693_v24, 0.0  ;;  %v1644_v19 = vpack.c.bf16 %v1628_v16, %v1628_v16  ;;  %v2625_v33 = vpop.f32.mrf.mxu3  ;;  %v2047_v24 = vunpack.i.l.bf16 %v2046_v27 }
  0xf3   :  { %v634_v31 = vsel %vm2400_vm8, %v629_v20, %v633_v2  ;;  %v999_v6 = vadd.f32 %v959_v37, %v822_v62 }
  0xf4   :  { %1743 = vrot.lane.b32.xlu2 %v1710_v12, %s2130_s3  ;;  %1741 = vrot.lane.b32.xlu1 %v1709_v0, %s2130_s3  ;;  %v653_v8 = vunpack.c.l.b16 %v634_v31  ;;  %v1660_v18 = vunpack.c.l.bf16 %v1644_v19  ;;  %v1627_v56 = vmax.f32 %v2466_v53, %v2047_v24  ;;  %v2637_v12 = vpop.f32.mrf.mxu0 }
  0xf5   :  { %v2629_v48 = vadd.f32 %v1337_v23, %v999_v6 }
  0xf6   :  { %v661_v58 = vpack.c.b16 %v653_v8, %v652_v36  ;;  %v1680_v35 = vmul.f32 %v2595_v52, %v1660_v18  ;;  %v1643_v9 = vpack.c.bf16 %v1627_v56, %v1627_v56 }
  0xf7   :  { %v2041_v14 = vpop.permute.xlu1 %2040 }
  0xf8   :  { %v2042_v26 = vunpack.i.l.bf16 %v2041_v14  ;;  %1854 = vmatmul.msk.bf16.gmra.mxu0 %vm668_vm9, %v661_v58  ;;  %v964_v43 = vpop.f32.mrf.mxu2  ;;  %v2043_v21 = vunpack.i.h.bf16 %v2041_v14  ;;  %v1700_v25 = vadd.f32 %v2600_v41, %v1680_v35  ;;  %v1659_v13 = vunpack.c.l.bf16 %v1643_v9 }
  0xf9   :  { %v2633_v39 = vpop.permute.xlu2 %2060 }
  0xfa   :  { %v1625_v30 = vmax.f32 %v2430_v59, %v2042_v26  ;;  %v2063_v0 = vunpack.i.h.bf16 %v2633_v39  ;;  %v1342_v29 = vpop.f32.mrf.mxu3  ;;  %v1626_v3 = vmax.f32 %v2426_v44, %v2043_v21  ;;  %v1716_v37 = vmax.f32 %v1700_v25, 0.0 }
  0xfc   :  { %v1641_v54 = vpack.c.bf16 %v1625_v30, %v1625_v30  ;;  %v1634_v53 = vmax.f32 %v2505_v10, %v2063_v0  ;;  %v1642_v63 = vpack.c.bf16 %v1626_v3, %v1626_v3 }
  0xfe   :  { %v1657_v55 = vunpack.c.l.bf16 %v1641_v54  ;;  %v1650_v23 = vpack.c.bf16 %v1634_v53, %v1634_v53  ;;  %v1658_v30 = vunpack.c.l.bf16 %v1642_v63 }
 0x100   :  { %v1677_v59 = vmul.f32 %v2595_v52, %v1657_v55  ;;  %v966_v5 = vpop.f32.mrf.mxu2  ;;  %v1666_v8 = vunpack.c.l.bf16 %v1650_v23  ;;  %v2062_v55 = vunpack.i.l.bf16 %v2633_v39  ;;  %v1678_v56 = vmul.f32 %v2595_v52, %v1658_v30 }
 0x102   :  { %v1697_v40 = vadd.f32 %v2600_v41, %v1677_v59  ;;  %v1344_v62 = vpop.f32.mrf.mxu3 }
 0x104   :  { %v1713_v42 = vmax.f32 %v1697_v40, 0.0 }
 0x106   :  { %1749 = vrot.lane.b32.xlu2 %v1713_v42, %s2130_s3 }
 0x108   :  { %v826_v27 = vpop.f32.mrf.mxu1 }
 0x10a   :  { %v2036_v50 = vpop.permute.xlu0 %2035 }
 0x10b   :  { %v2056_v45 = vpop.permute.xlu1 %2055  ;;  %v2038_v11 = vunpack.i.h.bf16 %v2036_v50  ;;  %v2037_v51 = vunpack.i.l.bf16 %v2036_v50 }
 0x10c   :  { %v2057_v57 = vunpack.i.l.bf16 %v2056_v45  ;;  %v2652_v18 = vpop.f32.mrf.mxu2  ;;  %v2058_v35 = vunpack.i.h.bf16 %v2056_v45  ;;  %v1633_v45 = vmax.f32 %v2509_v1, %v2062_v55 }
 0x10d   :  { %v1624_v47 = vmax.f32 %v2480_v22, %v2038_v11  ;;  %v1623_v38 = vmax.f32 %v2484_v28, %v2037_v51  ;;  %v1679_v22 = vmul.f32 %v2595_v52, %v1659_v13 }
 0x10e   :  { %v1631_v14 = vmax.f32 %v2492_v61, %v2057_v57  ;;  %1755 = vrot.lane.b32.xlu2 %v1716_v37, %s2130_s3  ;;  %v1632_v11 = vmax.f32 %v2488_v60, %v2058_v35  ;;  %v1698_v37 = vadd.f32 %v2600_v41, %v1678_v56  ;;  %v1649_v1 = vpack.c.bf16 %v1633_v45, %v1633_v45 }
 0x10f   :  { %v1640_v44 = vpack.c.bf16 %v1624_v47, %v1624_v47  ;;  %v1639_v2 = vpack.c.bf16 %v1623_v38, %v1623_v38 }
 0x110   :  { %v1647_v16 = vpack.c.bf16 %v1631_v14, %v1631_v14  ;;  %v828_v26 = vpop.f32.mrf.mxu1 }
 0x111   :  { %v1656_v17 = vunpack.c.l.bf16 %v1640_v44  ;;  %v1655_v10 = vunpack.c.l.bf16 %v1639_v2 }
 0x112   :  { %v1663_v31 = vunpack.c.l.bf16 %v1647_v16  ;;  %v2051_v36 = vpop.permute.xlu0 %2050 }
 0x113   :  { %v707_v20 = vpop.f32.mrf.mxu0  ;;  %v2053_v19 = vunpack.i.h.bf16 %v2051_v36  ;;  %v2052_v54 = vunpack.i.l.bf16 %v2051_v36  ;;  %v1675_v61 = vmul.f32 %v2595_v52, %v1655_v10  ;;  %v1676_v4 = vmul.f32 %v2595_v52, %v1656_v17 }
 0x114   :  { %v827_v28 = vadd.f32 %v826_v27, %v707_v20  ;;  %v1683_v6 = vmul.f32 %v2595_v52, %v1663_v31  ;;  %v971_v14 = vpop.f32.mrf.mxu2  ;;  %v1714_v17 = vmax.f32 %v1698_v37, 0.0 }
 0x115   :  { %v1630_v59 = vmax.f32 %v2448_v32, %v2053_v19  ;;  %v1629_v24 = vmax.f32 %v2452_v34, %v2052_v54  ;;  %v1695_v40 = vadd.f32 %v2600_v41, %v1675_v61  ;;  %v1696_v42 = vadd.f32 %v2600_v41, %v1676_v4 }
 0x116   :  { %v1001_v58 = vadd.f32 %v964_v43, %v827_v28  ;;  %v1703_v21 = vadd.f32 %v2600_v41, %v1683_v6  ;;  %v1686_v32 = vmul.f32 %v2595_v52, %v1666_v8  ;;  %v1699_v34 = vadd.f32 %v2600_v41, %v1679_v22 }
 0x117   :  { %v1646_v39 = vpack.c.bf16 %v1630_v59, %v1630_v59  ;;  %v1645_v25 = vpack.c.bf16 %v1629_v24, %v1629_v24  ;;  %v1711_v43 = vmax.f32 %v1695_v40, 0.0  ;;  %v1712_v27 = vmax.f32 %v1696_v42, 0.0 }
 0x118   :  { %v2660_v0 = vadd.f32 %v1342_v29, %v1001_v58  ;;  %v1719_v9 = vmax.f32 %v1703_v21, 0.0  ;;  %v2666_v50 = vpop.f32.mrf.mxu1  ;;  %v1706_v13 = vadd.f32 %v2600_v41, %v1686_v32  ;;  %v1715_v44 = vmax.f32 %v1699_v34, 0.0 }
 0x119   :  { %1745 = vrot.lane.b32.xlu0 %v1711_v43, %s2130_s3  ;;  %1747 = vrot.lane.b32.xlu1 %v1712_v27, %s2130_s3  ;;  %v1662_v51 = vunpack.c.l.bf16 %v1646_v39  ;;  %v1661_v53 = vunpack.c.l.bf16 %v1645_v25  ;;  %v1665_v28 = vunpack.c.l.bf16 %v1649_v1 }
 0x11a   :  { %1761 = vrot.lane.b32.xlu2 %v1719_v9, %s2130_s3 }
 0x11b   :  { %v709_v3 = vpop.f32.mrf.mxu0  ;;  %v1681_v10 = vmul.f32 %v2595_v52, %v1661_v53  ;;  %v1682_v20 = vmul.f32 %v2595_v52, %v1662_v51  ;;  %v1685_v42 = vmul.f32 %v2595_v52, %v1665_v28 }
 0x11c   :  { %v829_v29 = vadd.f32 %v828_v26, %v709_v3  ;;  %v2066_v57 = vpop.permute.xlu0 %2065  ;;  %v1648_v26 = vpack.c.bf16 %v1632_v11, %v1632_v11 }
 0x11d   :  { %v2068_v47 = vunpack.i.h.bf16 %v2066_v57  ;;  %v2067_v38 = vunpack.i.l.bf16 %v2066_v57  ;;  %v1701_v54 = vadd.f32 %v2600_v41, %v1681_v10  ;;  %v1702_v61 = vadd.f32 %v2600_v41, %v1682_v20  ;;  %v974_v8 = vpop.f32.mrf.mxu2 }
 0x11e   :  { %v1002_v63 = vadd.f32 %v966_v5, %v829_v29  ;;  %v2673_v2 = vpop.f32.mrf.mxu3  ;;  %v1722_v5 = vmax.f32 %v1706_v13, 0.0  ;;  %v1664_v19 = vunpack.c.l.bf16 %v1648_v26  ;;  %v1705_v39 = vadd.f32 %v2600_v41, %v1685_v42  ;;  %v2712_v26 = vld [vmem:[%s2792_s2] ss:$0 sm:$0xff]  ;;  %s2131_s2 = smov [#allocation6]  }
 0x11f   :  { %v1636_v23 = vmax.f32 %v2530_v7, %v2068_v47  ;;  %v1635_v16 = vmax.f32 %v2534_v15, %v2067_v38  ;;  %v1717_v59 = vmax.f32 %v1701_v54, 0.0  ;;  %v1718_v24 = vmax.f32 %v1702_v61, 0.0  ;;  %s1826_s13 = sshll.u32 %s2131_s2, 4  ;;  %s1827_s13 = int_to_ptr.vmem [resolvable:$true] %s1826_s13 }
 0x120   :  { %v2677_v60 = vadd.f32 %v1344_v62, %v1002_v63  ;;  %v833_v36 = vpop.f32.mrf.mxu1  ;;  %v1684_v40 = vmul.f32 %v2595_v52, %v1664_v19  ;;  %v1721_v32 = vmax.f32 %v1705_v39, 0.0  ;;  %v824_v13 = vadd.f32 %v2623_v49, %v2637_v12 }
 0x121   :  { %v1652_v30 = vpack.c.bf16 %v1636_v23, %v1636_v23  ;;  %v1651_v31 = vpack.c.bf16 %v1635_v16, %v1635_v16  ;;  %1751 = vrot.lane.b32.xlu0 %v1714_v17, %s2130_s3  ;;  %1753 = vrot.lane.b32.xlu1 %v1715_v44, %s2130_s3 }
 0x122   :  { %1767 = vrot.lane.b32.xlu2 %v1722_v5, %s2130_s3  ;;  %v1704_v21 = vadd.f32 %v2600_v41, %v1684_v40  ;;  %v1000_v63 = vadd.f32 %v2621_v46, %v824_v13 }
 0x123   :  { %v1668_v22 = vunpack.c.l.bf16 %v1652_v30  ;;  %v1667_v7 = vunpack.c.l.bf16 %v1651_v31  ;;  %v2684_v15 = vpop.f32.mrf.mxu0 }
 0x124   :  { %v1720_v9 = vmax.f32 %v1704_v21, 0.0  ;;  %v1378_v17 = vadd.f32 %v2625_v33, %v1000_v63  ;;  %v832_v19 = vadd.f32 %v2666_v50, %v2684_v15 }
 0x125   :  { %v1687_v4 = vmul.f32 %v2595_v52, %v1667_v7  ;;  %v1688_v62 = vmul.f32 %v2595_v52, %v1668_v22  ;;  %v976_v27 = vpop.f32.mrf.mxu2 }
 0x126   :  { %v1349_v58 = vpop.f32.mrf.mxu3  ;;  %v1398_v30 = vadd.f32 %v2712_v26, %v1378_v17 }
 0x127   :  { %v1707_v55 = vadd.f32 %v2600_v41, %v1687_v4  ;;  %v1708_v6 = vadd.f32 %v2600_v41, %v1688_v62  ;;  %v1003_v4 = vadd.f32 %v2652_v18, %v832_v19 }
 0x128   :  { %v836_v35 = vpop.f32.mrf.mxu1  ;;  %v1414_v5 = vmax.f32 %v1398_v30, 0.0  ;;  %v1400_v30 = vadd.f32 %v2712_v26, %v2677_v60 }
 0x129   :  { %1757 = vrot.lane.b32.xlu0 %v1717_v59, %s2130_s3  ;;  %1759 = vrot.lane.b32.xlu1 %v1718_v24, %s2130_s3  ;;  %v1723_v51 = vmax.f32 %v1707_v55, 0.0  ;;  %v1724_v53 = vmax.f32 %v1708_v6, 0.0  ;;  %v1381_v55 = vadd.f32 %v2673_v2, %v1003_v4 }
 0x12b   :  { %v714_v56 = vpop.f32.mrf.mxu0  ;;  %v1401_v50 = vadd.f32 %v2712_v26, %v1381_v55 }
 0x12c   :  { %v834_v25 = vadd.f32 %v833_v36, %v714_v56 }
 0x12d   :  { %v1417_v40 = vmax.f32 %v1401_v50, 0.0 }
 0x12e   :  { %v1004_v43 = vadd.f32 %v971_v14, %v834_v25  ;;  %v979_v37 = vpop.f32.mrf.mxu2 }
 0x130   :  { %v2698_v34 = vadd.f32 %v1349_v58, %v1004_v43  ;;  %v838_v52 = vpop.f32.mrf.mxu1 }
 0x131   :  { %1763 = vrot.lane.b32.xlu0 %v1720_v9, %s2130_s3  ;;  %1765 = vrot.lane.b32.xlu1 %v1721_v32, %s2130_s3 }
 0x132   :  { %v1352_v3 = vpop.f32.mrf.mxu3 }
 0x133   :  { %v717_v45 = vpop.f32.mrf.mxu0 }
 0x134   :  { %v837_v29 = vadd.f32 %v836_v35, %v717_v45  ;;  %v1397_v35 = vadd.f32 %v2712_v26, %v2629_v48 }
 0x136   :  { %v1005_v11 = vadd.f32 %v974_v8, %v837_v29  ;;  %v981_v23 = vpop.f32.mrf.mxu2  ;;  %v1413_v43 = vmax.f32 %v1397_v35, 0.0 }
 0x138   :  { %v2702_v57 = vadd.f32 %v1352_v3, %v1005_v11  ;;  %v841_v47 = vpop.f32.mrf.mxu1 }
 0x139   :  { %1769 = vrot.lane.b32.xlu0 %v1723_v51, %s2130_s3  ;;  %1771 = vrot.lane.b32.xlu1 %v1724_v53, %s2130_s3 }
 0x13a   :  { %v1354_v41 = vpop.f32.mrf.mxu3 }
 0x13b   :  { %v719_v38 = vpop.f32.mrf.mxu0 }
 0x13c   :  { %v839_v6 = vadd.f32 %v838_v52, %v719_v38 }
 0x13e   :  { %v984_v36 = vpop.f32.mrf.mxu2  ;;  %v1006_v15 = vadd.f32 %v976_v27, %v839_v6 }
 0x140   :  { %v843_v44 = vpop.f32.mrf.mxu1  ;;  %v1384_v42 = vadd.f32 %v1354_v41, %v1006_v15 }
 0x142   :  { %v1357_v14 = vpop.f32.mrf.mxu3  ;;  %v1404_v25 = vadd.f32 %v2712_v26, %v1384_v42 }
 0x143   :  { %v722_v1 = vpop.f32.mrf.mxu0 }
 0x144   :  { %v842_v16 = vadd.f32 %v841_v47, %v722_v1  ;;  %v1420_v52 = vmax.f32 %v1404_v25, 0.0 }
 0x146   :  { %v1007_v10 = vadd.f32 %v979_v37, %v842_v16  ;;  %v2727_v8 = vpop.f32.mrf.mxu2 }
 0x148   :  { %v2715_v20 = vadd.f32 %v1357_v14, %v1007_v10  ;;  %v846_v46 = vpop.f32.mrf.mxu1  ;;  %v1399_v10 = vadd.f32 %v2712_v26, %v2660_v0  ;;  %v1403_v0 = vadd.f32 %v2712_v26, %v2702_v57 }
 0x14a   :  { %v1359_v49 = vpop.f32.mrf.mxu3 }
 0x14b   :  { %v724_v12 = vpop.f32.mrf.mxu0 }
 0x14c   :  { %v844_v31 = vadd.f32 %v843_v44, %v724_v12  ;;  %v1416_v12 = vmax.f32 %v1400_v30, 0.0 }
 0x14e   :  { %v1744_v22 = vpop.permute.xlu2 %1743  ;;  %v1008_v7 = vadd.f32 %v981_v23, %v844_v31  ;;  %v989_v56 = vpop.f32.mrf.mxu2 }
 0x14f   :  { %v1791_v28 = vsel %vm1789_vm10, %v1414_v5, %v1744_v22 }
 0x150   :  { %1807 = vst.msk [vmem:[#allocation6 + $0x8] sm:$0xff] %vm668_vm9, %v1791_v28  ;;  %v2722_v33 = vadd.f32 %v1359_v49, %v1008_v7  ;;  %v2725_v62 = vpop.f32.mrf.mxu1  ;;  %v1415_v49 = vmax.f32 %v1399_v10, 0.0  ;;  %v1402_v28 = vadd.f32 %v2712_v26, %v2698_v34  ;;  %v1405_v34 = vadd.f32 %v2712_v26, %v2715_v20 }
 0x152   :  { %v1362_v54 = vpop.f32.mrf.mxu3  ;;  %v1418_v19 = vmax.f32 %v1402_v28, 0.0  ;;  %v1406_v57 = vadd.f32 %v2712_v26, %v2722_v33 }
 0x153   :  { %v727_v61 = vpop.f32.mrf.mxu0 }
 0x154   :  { %v847_v21 = vadd.f32 %v846_v46, %v727_v61 }
 0x156   :  { %v1009_v32 = vadd.f32 %v984_v36, %v847_v21  ;;  %v991_v53 = vpop.f32.mrf.mxu2 }
 0x158   :  { %v851_v24 = vpop.f32.mrf.mxu1  ;;  %v1387_v29 = vadd.f32 %v1362_v54, %v1009_v32  ;;  %v1419_v54 = vmax.f32 %v1403_v0, 0.0 }
 0x15a   :  { %v2730_v59 = vpop.f32.mrf.mxu3  ;;  %v1407_v37 = vadd.f32 %v2712_v26, %v1387_v29 }
 0x15b   :  { %v729_v58 = vpop.f32.mrf.mxu0 }
 0x15c   :  { %v1423_v13 = vmax.f32 %v1407_v37, 0.0  ;;  %v849_v61 = vadd.f32 %v2725_v62, %v729_v58 }
 0x15e   :  { %v1010_v42 = vadd.f32 %v2727_v8, %v849_v61 }
 0x160   :  { %v1750_v18 = vpop.permute.xlu2 %1749  ;;  %v853_v45 = vpop.f32.mrf.mxu1  ;;  %v1388_v21 = vadd.f32 %v2730_v59, %v1010_v42 }
 0x161   :  { %v1794_v39 = vsel %vm1789_vm10, %v1417_v40, %v1750_v18  ;;  %v1422_v18 = vmax.f32 %v1406_v57, 0.0 }
 0x162   :  { %1810 = vst.msk [vmem:[#allocation6 + $0x20] sm:$0xff] %vm668_vm9, %v1794_v39  ;;  %v1367_v9 = vpop.f32.mrf.mxu3  ;;  %v1408_v8 = vadd.f32 %v2712_v26, %v1388_v21 }
 0x163   :  { %v732_v2 = vpop.f32.mrf.mxu0 }
 0x164   :  { %v852_v4 = vadd.f32 %v851_v24, %v732_v2  ;;  %v1421_v24 = vmax.f32 %v1405_v34, 0.0 }
 0x166   :  { %v1742_v27 = vpop.permute.xlu1 %1741  ;;  %v1011_v35 = vadd.f32 %v989_v56, %v852_v4 }
 0x167   :  { %v1790_v3 = vsel %vm1789_vm10, %v1413_v43, %v1742_v27 }
 0x168   :  { %1806 = vst.msk [vmem:[#allocation6] sm:$0xff] %vm668_vm9, %v1790_v3  ;;  %v1756_v48 = vpop.permute.xlu2 %1755  ;;  %v1389_v39 = vadd.f32 %v1367_v9, %v1011_v35 }
 0x169   :  { %v1797_v11 = vsel %vm1789_vm10, %v1420_v52, %v1756_v48  ;;  %v1424_v52 = vmax.f32 %v1408_v8, 0.0 }
 0x16a   :  { %1813 = vst.msk [vmem:[#allocation6 + $0x38] sm:$0xff] %vm668_vm9, %v1797_v11  ;;  %v1369_v38 = vpop.f32.mrf.mxu3  ;;  %v856_v7 = vpop.f32.mrf.mxu1  ;;  %v1409_v56 = vadd.f32 %v2712_v26, %v1389_v39 }
 0x16b   :  { %v734_v51 = vpop.f32.mrf.mxu0  ;;  %v994_v60 = vpop.f32.mrf.mxu2 }
 0x16c   :  { %v854_v41 = vadd.f32 %v853_v45, %v734_v51  ;;  %v1425_v48 = vmax.f32 %v1409_v56, 0.0 }
 0x16e   :  { %v1012_v47 = vadd.f32 %v991_v53, %v854_v41 }
 0x170   :  { %v1390_v63 = vadd.f32 %v1369_v38, %v1012_v47 }
 0x172   :  { %v1410_v1 = vadd.f32 %v2712_v26, %v1390_v63  ;;  %v858_v58 = vpop.f32.mrf.mxu1 }
 0x173   :  { %v996_v25 = vpop.f32.mrf.mxu2 }
 0x174   :  { %v1762_v14 = vpop.permute.xlu2 %1761  ;;  %v1426_v23 = vmax.f32 %v1410_v1, 0.0  ;;  %v1372_v40 = vpop.f32.mrf.mxu3 }
 0x175   :  { %v1800_v44 = vsel %vm1789_vm10, %v1423_v13, %v1762_v14  ;;  %v737_v22 = vpop.f32.mrf.mxu0 }
 0x176   :  { %1816 = vst.msk [vmem:[#allocation6 + $0x50] sm:$0xff] %vm668_vm9, %v1800_v44  ;;  %v857_v2 = vadd.f32 %v856_v7, %v737_v22 }
 0x178   :  { %v1013_v3 = vadd.f32 %v994_v60, %v857_v2 }
 0x17a   :  { %v1391_v45 = vadd.f32 %v1372_v40, %v1013_v3 }
 0x17c   :  { %v1768_v16 = vpop.permute.xlu2 %1767  ;;  %v1374_v9 = vpop.f32.mrf.mxu3  ;;  %v1411_v37 = vadd.f32 %v2712_v26, %v1391_v45 }
 0x17d   :  { %v1803_v17 = vsel %vm1789_vm10, %v1426_v23, %v1768_v16  ;;  %v739_v62 = vpop.f32.mrf.mxu0 }
 0x17e   :  { %1819 = vst.msk [vmem:[#allocation6 + $0x68] sm:$0xff] %vm668_vm9, %v1803_v17  ;;  %v859_v20 = vadd.f32 %v858_v58, %v739_v62  ;;  %v1427_v38 = vmax.f32 %v1411_v37, 0.0 }
 0x180   :  { %v1014_v59 = vadd.f32 %v996_v25, %v859_v20 }
 0x182   :  { %v1392_v29 = vadd.f32 %v1374_v9, %v1014_v59 }
 0x184   :  { %v1412_v47 = vadd.f32 %v2712_v26, %v1392_v29 }
 0x186   :  { %v1428_v13 = vmax.f32 %v1412_v47, 0.0 }
 0x18b   :  { %v1746_v46 = vpop.permute.xlu0 %1745  ;;  %v1748_v31 = vpop.permute.xlu1 %1747 }
 0x18c   :  { %v1792_v5 = vsel %vm1789_vm10, %v1415_v49, %v1746_v46  ;;  %v1793_v36 = vsel %vm1789_vm10, %v1416_v12, %v1748_v31 }
 0x18d   :  { %1808 = vst.msk [vmem:[#allocation6 + $0x10] sm:$0xff] %vm668_vm9, %v1792_v5 }
 0x18e   :  { %1809 = vst.msk [vmem:[#allocation6 + $0x18] sm:$0xff] %vm668_vm9, %v1793_v36 }
 0x193   :  { %v1752_v55 = vpop.permute.xlu0 %1751  ;;  %v1754_v6 = vpop.permute.xlu1 %1753 }
 0x194   :  { %v1795_v50 = vsel %vm1789_vm10, %v1418_v19, %v1752_v55  ;;  %v1796_v15 = vsel %vm1789_vm10, %v1419_v54, %v1754_v6 }
 0x195   :  { %1811 = vst.msk [vmem:[#allocation6 + $0x28] sm:$0xff] %vm668_vm9, %v1795_v50 }
 0x196   :  { %1812 = vst.msk [vmem:[#allocation6 + $0x30] sm:$0xff] %vm668_vm9, %v1796_v15 }
 0x19b   :  { %v1758_v43 = vpop.permute.xlu0 %1757  ;;  %v1760_v33 = vpop.permute.xlu1 %1759 }
 0x19c   :  { %v1798_v32 = vsel %vm1789_vm10, %v1421_v24, %v1758_v43  ;;  %v1799_v27 = vsel %vm1789_vm10, %v1422_v18, %v1760_v33 }
 0x19d   :  { %1814 = vst.msk [vmem:[#allocation6 + $0x40] sm:$0xff] %vm668_vm9, %v1798_v32 }
 0x19e   :  { %1815 = vst.msk [vmem:[#allocation6 + $0x48] sm:$0xff] %vm668_vm9, %v1799_v27 }
 0x1a3   :  { %v1764_v11 = vpop.permute.xlu0 %1763  ;;  %v1766_v51 = vpop.permute.xlu1 %1765 }
 0x1a4   :  { %v1801_v53 = vsel %vm1789_vm10, %v1424_v52, %v1764_v11  ;;  %v1802_v41 = vsel %vm1789_vm10, %v1425_v48, %v1766_v51 }
 0x1a5   :  { %1817 = vst.msk [vmem:[#allocation6 + $0x58] sm:$0xff] %vm668_vm9, %v1801_v53 }
 0x1a6   :  { %1818 = vst.msk [vmem:[#allocation6 + $0x60] sm:$0xff] %vm668_vm9, %v1802_v41 }
 0x1ab   :  { %v1770_v63 = vpop.permute.xlu0 %1769  ;;  %v1772_v14 = vpop.permute.xlu1 %1771 }
 0x1ac   :  { %v1804_v44 = vsel %vm1789_vm10, %v1427_v38, %v1770_v63  ;;  %v1805_v1 = vsel %vm1789_vm10, %v1428_v13, %v1772_v14 }
 0x1ad   :  { %1820 = vst.msk [vmem:[#allocation6 + $0x70] sm:$0xff] %vm668_vm9, %v1804_v44 }
 0x1ae   :  { %1821 = vst.msk [vmem:[#allocation6 + $0x78] sm:$0xff] %vm668_vm9, %v1805_v1 }
 0x1af   :  { %1834 = dma.vmem_to_hbm [thread:$0]  %s1827_s13, 2048, %s1829_s16, [#allocation5], %s2132_s17, %s2132_s17, %s2133_s18  }
 0x1b0   :  { %2122 = dma.done.wait [#allocation5], 2048  }
 0x1b1   :  { %2123 = vsyncadd [#allocation5], 4294965248 }
 0x1b2   :  { %1839 = vsyncpa [#allocation4], 1 }
 0x1b3   :  { %1840 = vsyncpa [#allocation5], 1 }

</bundles_post_ra>
